<compile_context>
chip_gen: v6e
topology: v6e:2x2x1
jax: 0.10.0
libtpu: 0.0.40
codegen_flags: <defaults>
</compile_context>

<pallas_src>
import functools
import math

import jax
import jax.numpy as jnp
from jax.experimental import pallas as pl
from jax.experimental.pallas import tpu as pltpu

# ----------------------------- small synthetic DistilBERT config -----------------------------
VOCAB = 100
MAX_POS = 16
HIDDEN = 32          # (real DistilBERT: 768)
N_HEADS = 4          # (real: 12)
HEAD_DIM = HIDDEN // N_HEADS
FFN = 64             # (real: 3072)
N_LAYERS = 6
N_OUT = 14           # regressor output size
PAD_OUT = 128        # regressor output padded to a full lane width (slice to 14 outside)
LN_EPS = 1e-12
VEC_WIDTH = 128      # lane width of the packed per-layer vector slab

# rows of the packed per-layer vector slab (N_LAYERS, 8, 128)
(ROW_QKV_B, ROW_O_B, ROW_LN1_G, ROW_LN1_B,
 ROW_F1_B, ROW_F2_B, ROW_LN2_G, ROW_LN2_B) = range(8)
N_VEC_ROWS = 8


# -------------------------------------- fused model kernel -----------------------------------
def _fused_model_kernel(
    # inputs (all fully VMEM-resident; no grid)
    x0_ref,       # (B*S, H)         f32  word+pos embeddings (pre-LN)
    bias_ref,     # (B, 1, S)        f32  additive attention-mask bias (0 or -1e9)
    embln_ref,    # (2, H)           f32  embedding LayerNorm gamma (row 0) / beta (row 1)
    qkvw_ref,     # (L, H, 3H)       bf16 fused QKV weights
    ow_ref,       # (L, H, H)        bf16 attention out proj
    f1w_ref,      # (L, H, F)        bf16 FFN lin1
    f2w_ref,      # (L, F, H)        bf16 FFN lin2
    vecs_ref,     # (L, 8, 128)      f32  packed per-layer bias/LN vectors
    regw_ref,     # (4H, PAD_OUT)    bf16 regressor weight (zero-padded columns)
    regb_ref,     # (1, PAD_OUT)     f32  regressor bias (zero-padded)
    # output
    out_ref,      # (B, PAD_OUT)     f32
    # scratch
    x_sc,         # VMEM (B*S, H)    f32  resident hidden state
    cls_sc,       # VMEM (L, B, H)   f32  per-layer [CLS] rows
    *, batch, seq,
):
    scale = 1.0 / math.sqrt(HEAD_DIM)

    def layer_norm(x, g, b):
        mu = jnp.mean(x, axis=-1, keepdims=True)
        var = jnp.mean(jnp.square(x - mu), axis=-1, keepdims=True)
        return (x - mu) * jax.lax.rsqrt(var + LN_EPS) * g + b

    # ------ embedding LayerNorm (once, before the layer loop) ------
    x_sc[...] = layer_norm(x0_ref[...], embln_ref[0:1, :], embln_ref[1:2, :])

    bias = bias_ref[...]                                   # (B, 1, S), broadcasts over queries

    # --------------------------- transformer layers (in-kernel loop) ---------------------------
    @pl.loop(0, N_LAYERS)
    def _(l):
        x = x_sc[...]                                      # (B*S, H) f32
        vec = vecs_ref[l]                                  # (8, 128) packed per-layer vectors
        qkv_b = vec[ROW_QKV_B:ROW_QKV_B + 1, :3 * HIDDEN]
        o_b   = vec[ROW_O_B:ROW_O_B + 1, :HIDDEN]
        ln1_g = vec[ROW_LN1_G:ROW_LN1_G + 1, :HIDDEN]
        ln1_b = vec[ROW_LN1_B:ROW_LN1_B + 1, :HIDDEN]
        f1_b  = vec[ROW_F1_B:ROW_F1_B + 1, :FFN]
        f2_b  = vec[ROW_F2_B:ROW_F2_B + 1, :HIDDEN]
        ln2_g = vec[ROW_LN2_G:ROW_LN2_G + 1, :HIDDEN]
        ln2_b = vec[ROW_LN2_B:ROW_LN2_B + 1, :HIDDEN]

        # fused QKV projection: bf16 operands, f32 accumulation
        qkv = jnp.dot(x.astype(jnp.bfloat16), qkvw_ref[l],
                      preferred_element_type=jnp.float32) + qkv_b       # (B*S, 3H)
        qkv = qkv.reshape(batch, seq, 3 * HIDDEN)                       # leading-dim split only

        # -------- self-attention: batched-over-B einsums per head --------
        head_outs = []
        for h in range(N_HEADS):                                        # static, tiny nH
            q_off = 0 * HIDDEN + h * HEAD_DIM
            k_off = 1 * HIDDEN + h * HEAD_DIM
            v_off = 2 * HIDDEN + h * HEAD_DIM
            q = qkv[:, :, q_off:q_off + HEAD_DIM] * scale               # (B, S, Dh)
            k = qkv[:, :, k_off:k_off + HEAD_DIM]
            v = qkv[:, :, v_off:v_off + HEAD_DIM]
            s = jnp.einsum('bqd,bkd->bqk', q, k,
                           preferred_element_type=jnp.float32) + bias   # (B, S, S)
            s = s - jnp.max(s, axis=-1, keepdims=True)
            p = jnp.exp(s)
            p = p / jnp.sum(p, axis=-1, keepdims=True)                  # exact reciprocal
            head_outs.append(jnp.einsum('bqk,bkd->bqd', p, v,
                                        preferred_element_type=jnp.float32))
        ctx = jnp.concatenate(head_outs, axis=-1).reshape(batch * seq, HIDDEN)

        sa = jnp.dot(ctx.astype(jnp.bfloat16), ow_ref[l],
                     preferred_element_type=jnp.float32) + o_b
        x1 = layer_norm(sa + x, ln1_g, ln1_b)                           # post-attention LN

        # ------------------------------ FFN -------------------------------
        h1 = jnp.dot(x1.astype(jnp.bfloat16), f1w_ref[l],
                     preferred_element_type=jnp.float32) + f1_b
        # TODO(synk): HF DistilBERT uses the exact erf GELU; tanh approximation kept for
        # Mosaic-friendly EUP lowering (small numeric divergence).
        h1 = jax.nn.gelu(h1, approximate=True)
        h2 = jnp.dot(h1.astype(jnp.bfloat16), f2w_ref[l],
                     preferred_element_type=jnp.float32) + f2_b
        x2 = layer_norm(h2 + x1, ln2_g, ln2_b)                          # post-FFN LN

        x_sc[...] = x2                                                  # hidden state stays resident
        # one sublane-strided load gathers every batch's [CLS] row (rows 0, S, 2S, ...)
        cls_sc[l] = x_sc[pl.ds(0, batch, stride=seq), :]                # (B, H)

    # --------- concat [CLS] of layers [-1, -2, -3, -4] + fused regressor (lane-padded) ---------
    cls_cat = jnp.concatenate(
        [cls_sc[N_LAYERS - 1 - i] for i in range(4)], axis=-1)          # (B, 4H)
    out = jnp.dot(cls_cat.astype(jnp.bfloat16), regw_ref[...],
                  preferred_element_type=jnp.float32) + regb_ref[...]
    out_ref[...] = out.astype(out_ref.dtype)


# ---------------------------------------- model glue -----------------------------------------
def distilbert_concat_forward(params, input_ids, attention_mask):
    B, S = input_ids.shape

    # Embedding gather + position add stay plain-JAX glue; the embedding LN runs in-kernel.
    x0 = params["word_emb"][input_ids] + params["pos_emb"][jnp.arange(S)][None, :, :]
    x0 = x0.reshape(B * S, HIDDEN).astype(jnp.float32)

    # Additive mask bias (0 keep / -1e9 masked), pre-shaped to broadcast against (B, S, S).
    mask_bias = ((attention_mask.astype(jnp.float32) - 1.0) * 1e9).reshape(B, 1, S)

    vmem = pl.BlockSpec(memory_space=pltpu.MemorySpace.VMEM)
    out_padded = pl.pallas_call(
        functools.partial(_fused_model_kernel, batch=B, seq=S),
        out_shape=jax.ShapeDtypeStruct((B, PAD_OUT), jnp.float32),
        in_specs=[vmem] * 10,
        out_specs=vmem,
        scratch_shapes=[
            pltpu.VMEM((B * S, HIDDEN), jnp.float32),                   # resident hidden state
            pltpu.VMEM((N_LAYERS, B, HIDDEN), jnp.float32),             # per-layer CLS rows
        ],
        compiler_params=pltpu.CompilerParams(vmem_limit_bytes=64 * 1024 * 1024),
    )(
        x0, mask_bias, params["emb_ln"],
        params["qkv_w"], params["o_w"], params["ff1_w"], params["ff2_w"],
        params["layer_vecs"], params["reg_w_pad"], params["reg_b_pad"],
    )
    return out_padded[:, :N_OUT]                                        # (B, 14)


# ---------------------------------------- parameters -----------------------------------------
def init_params(key):
    # TODO(synk): pretrained distilbert-base-cased weights cannot be loaded in-script
    # (no file/network access); random init at a small synthetic config is used instead.
    keys = jax.random.split(key, 8)
    init = lambda k, shape: jax.random.normal(k, shape, jnp.float32) * 0.02

    # per-layer bias / LN vectors, packed into one (N_LAYERS, 8, 128) slab
    qkv_b = jnp.zeros((N_LAYERS, 3 * HIDDEN), jnp.float32)
    o_b   = jnp.zeros((N_LAYERS, HIDDEN), jnp.float32)
    ln1_g = jnp.ones((N_LAYERS, HIDDEN), jnp.float32)
    ln1_b = jnp.zeros((N_LAYERS, HIDDEN), jnp.float32)
    f1_b  = jnp.zeros((N_LAYERS, FFN), jnp.float32)
    f2_b  = jnp.zeros((N_LAYERS, HIDDEN), jnp.float32)
    ln2_g = jnp.ones((N_LAYERS, HIDDEN), jnp.float32)
    ln2_b = jnp.zeros((N_LAYERS, HIDDEN), jnp.float32)

    def pad_row(v):  # (L, n) -> (L, 128)
        return jnp.pad(v, ((0, 0), (0, VEC_WIDTH - v.shape[-1])))

    layer_vecs = jnp.stack(
        [pad_row(qkv_b), pad_row(o_b), pad_row(ln1_g), pad_row(ln1_b),
         pad_row(f1_b), pad_row(f2_b), pad_row(ln2_g), pad_row(ln2_b)],
        axis=1)                                                         # (L, 8, 128)

    params = {
        "word_emb": init(keys[0], (VOCAB, HIDDEN)),
        "pos_emb": init(keys[1], (MAX_POS, HIDDEN)),
        "emb_ln": jnp.concatenate(
            [jnp.ones((1, HIDDEN), jnp.float32), jnp.zeros((1, HIDDEN), jnp.float32)], axis=0),
        # Stacked per-layer weights (leading layer axis), QKV fused along the output dim, bf16.
        "qkv_w": init(keys[2], (N_LAYERS, HIDDEN, 3 * HIDDEN)).astype(jnp.bfloat16),
        "o_w":   init(keys[3], (N_LAYERS, HIDDEN, HIDDEN)).astype(jnp.bfloat16),
        "ff1_w": init(keys[4], (N_LAYERS, HIDDEN, FFN)).astype(jnp.bfloat16),
        "ff2_w": init(keys[5], (N_LAYERS, FFN, HIDDEN)).astype(jnp.bfloat16),
        "layer_vecs": layer_vecs,
    }

    # nn.Linear(4*H -> 14) analogue; columns zero-padded to 128 lanes for lane-dense stores.
    reg_w = init(keys[6], (4 * HIDDEN, N_OUT))
    reg_b = init(keys[7], (1, N_OUT))
    params["reg_w_pad"] = jnp.pad(reg_w, ((0, 0), (0, PAD_OUT - N_OUT))).astype(jnp.bfloat16)
    params["reg_b_pad"] = jnp.pad(reg_b, ((0, 0), (0, PAD_OUT - N_OUT)))
    return params


# ------------------------------------------- main --------------------------------------------
if __name__ == "__main__":
    key = jax.random.PRNGKey(0)
    pkey, ikey = jax.random.split(key)

    params = init_params(pkey)

    B, S = 2, 8
    input_ids = jax.random.randint(ikey, (B, S), 0, VOCAB, dtype=jnp.int32)
    attention_mask = jnp.ones((B, S), jnp.float32).at[1, -2:].set(0.0)  # pad last 2 tokens of seq 1

    fwd = jax.jit(distilbert_concat_forward)
    out = fwd(params, input_ids, attention_mask)
    out = jax.block_until_ready(out)

    assert out.shape == (B, N_OUT), out.shape
    assert bool(jnp.all(jnp.isfinite(out)))
    print("KERNEL_OK")
</pallas_src>

<mosaic_0001>
module attributes {stable_mosaic.version = 11 : i64} {
  func.func @_fused_model_kernel(%arg0: memref<16x32xf32, #tpu.memory_space<vmem>>, %arg1: memref<2x1x8xf32, #tpu.memory_space<vmem>>, %arg2: memref<2x32xf32, #tpu.memory_space<vmem>>, %arg3: memref<6x32x96xbf16, #tpu.memory_space<vmem>>, %arg4: memref<6x32x32xbf16, #tpu.memory_space<vmem>>, %arg5: memref<6x32x64xbf16, #tpu.memory_space<vmem>>, %arg6: memref<6x64x32xbf16, #tpu.memory_space<vmem>>, %arg7: memref<6x8x128xf32, #tpu.memory_space<vmem>>, %arg8: memref<128x128xbf16, #tpu.memory_space<vmem>>, %arg9: memref<1x128xf32, #tpu.memory_space<vmem>>, %arg10: memref<2x128xf32, #tpu.memory_space<vmem>>, %arg11: memref<16x32xf32, #tpu.memory_space<vmem>>, %arg12: memref<6x2x32xf32, #tpu.memory_space<vmem>>) attributes {dimension_semantics = [], scalar_prefetch = 0 : i64, scratch_operands = 2 : i64, tpu.core_type = #tpu.core_type<tc>} {
    %c0 = arith.constant 0 : index
    %c0_0 = arith.constant 0 : index
    %0 = vector.load %arg0[%c0, %c0_0] : memref<16x32xf32, #tpu.memory_space<vmem>>, vector<16x32xf32>
    %c0_1 = arith.constant 0 : index
    %c0_2 = arith.constant 0 : index
    %1 = vector.load %arg2[%c0_1, %c0_2] : memref<2x32xf32, #tpu.memory_space<vmem>>, vector<1x32xf32>
    %c1 = arith.constant 1 : index
    %c0_3 = arith.constant 0 : index
    %2 = vector.load %arg2[%c1, %c0_3] : memref<2x32xf32, #tpu.memory_space<vmem>>, vector<1x32xf32>
    %cst = arith.constant dense<0.000000e+00> : vector<16xf32>
    %3 = vector.multi_reduction <add>, %0, %cst [1] : vector<16x32xf32> to vector<16xf32>
    %4 = vector.shape_cast %3 : vector<16xf32> to vector<16x1xf32>
    %cst_4 = arith.constant 3.200000e+01 : f32
    %5 = vector.broadcast %cst_4 : f32 to vector<16x1xf32>
    %6 = arith.divf %4, %5 : vector<16x1xf32>
    %7 = vector.broadcast %6 : vector<16x1xf32> to vector<16x32xf32>
    %8 = arith.subf %0, %7 : vector<16x32xf32>
    %9 = arith.mulf %8, %8 : vector<16x32xf32>
    %cst_5 = arith.constant dense<0.000000e+00> : vector<16xf32>
    %10 = vector.multi_reduction <add>, %9, %cst_5 [1] : vector<16x32xf32> to vector<16xf32>
    %11 = vector.shape_cast %10 : vector<16xf32> to vector<16x1xf32>
    %cst_6 = arith.constant 3.200000e+01 : f32
    %12 = vector.broadcast %cst_6 : f32 to vector<16x1xf32>
    %13 = arith.divf %11, %12 : vector<16x1xf32>
    %14 = vector.broadcast %6 : vector<16x1xf32> to vector<16x32xf32>
    %15 = arith.subf %0, %14 : vector<16x32xf32>
    %cst_7 = arith.constant 9.99999996E-13 : f32
    %16 = vector.broadcast %cst_7 : f32 to vector<16x1xf32>
    %17 = arith.addf %13, %16 : vector<16x1xf32>
    %18 = math.rsqrt %17 : vector<16x1xf32>
    %19 = vector.broadcast %18 : vector<16x1xf32> to vector<16x32xf32>
    %20 = arith.mulf %15, %19 : vector<16x32xf32>
    %21 = vector.broadcast %1 : vector<1x32xf32> to vector<16x32xf32>
    %22 = arith.mulf %20, %21 : vector<16x32xf32>
    %23 = vector.broadcast %2 : vector<1x32xf32> to vector<16x32xf32>
    %24 = arith.addf %22, %23 : vector<16x32xf32>
    %c0_8 = arith.constant 0 : index
    %c0_9 = arith.constant 0 : index
    %25 = vector.load %arg11[%c0_8, %c0_9] : memref<16x32xf32, #tpu.memory_space<vmem>>, vector<16x32xf32>
    tpu.vector_store %arg11[%c0_8, %c0_9], %24 {strides = array<i32>} : memref<16x32xf32, #tpu.memory_space<vmem>>, vector<16x32xf32>,
    %c0_10 = arith.constant 0 : index
    %c0_11 = arith.constant 0 : index
    %c0_12 = arith.constant 0 : index
    %26 = vector.load %arg1[%c0_10, %c0_11, %c0_12] : memref<2x1x8xf32, #tpu.memory_space<vmem>>, vector<2x1x8xf32>
    %c0_i32 = arith.constant 0 : i32
    %c6_i32 = arith.constant 6 : i32
    %27 = arith.addi %c0_i32, %c6_i32 : i32
    %c1_i32 = arith.constant 1 : i32
    scf.for %arg13 = %c0_i32 to %27 step %c1_i32  : i32 {
      %c1_i32_29 = arith.constant 1 : i32
      %44 = arith.muli %arg13, %c1_i32_29 : i32
      %c0_i32_30 = arith.constant 0 : i32
      %45 = arith.addi %c0_i32_30, %44 : i32
      %c0_31 = arith.constant 0 : index
      %c0_32 = arith.constant 0 : index
      %46 = vector.load %arg11[%c0_31, %c0_32] : memref<16x32xf32, #tpu.memory_space<vmem>>, vector<16x32xf32>
      %47 = arith.index_cast %45 : i32 to index
      %c0_33 = arith.constant 0 : index
      %c0_34 = arith.constant 0 : index
      %48 = vector.load %arg7[%47, %c0_33, %c0_34] : memref<6x8x128xf32, #tpu.memory_space<vmem>>, vector<1x8x128xf32>
      %49 = vector.shape_cast %48 : vector<1x8x128xf32> to vector<8x128xf32>
      %50 = vector.extract_strided_slice %49 {offsets = [0, 0], sizes = [1, 96], strides = [1, 1]} : vector<8x128xf32> to vector<1x96xf32>
      %51 = vector.extract_strided_slice %49 {offsets = [1, 0], sizes = [1, 32], strides = [1, 1]} : vector<8x128xf32> to vector<1x32xf32>
      %52 = vector.extract_strided_slice %49 {offsets = [2, 0], sizes = [1, 32], strides = [1, 1]} : vector<8x128xf32> to vector<1x32xf32>
      %53 = vector.extract_strided_slice %49 {offsets = [3, 0], sizes = [1, 32], strides = [1, 1]} : vector<8x128xf32> to vector<1x32xf32>
      %54 = vector.extract_strided_slice %49 {offsets = [4, 0], sizes = [1, 64], strides = [1, 1]} : vector<8x128xf32> to vector<1x64xf32>
      %55 = vector.extract_strided_slice %49 {offsets = [5, 0], sizes = [1, 32], strides = [1, 1]} : vector<8x128xf32> to vector<1x32xf32>
      %56 = vector.extract_strided_slice %49 {offsets = [6, 0], sizes = [1, 32], strides = [1, 1]} : vector<8x128xf32> to vector<1x32xf32>
      %57 = vector.extract_strided_slice %49 {offsets = [7, 0], sizes = [1, 32], strides = [1, 1]} : vector<8x128xf32> to vector<1x32xf32>
      %58 = arith.truncf %46 : vector<16x32xf32> to vector<16x32xbf16>
      %59 = arith.index_cast %45 : i32 to index
      %c0_35 = arith.constant 0 : index
      %c0_36 = arith.constant 0 : index
      %60 = vector.load %arg3[%59, %c0_35, %c0_36] : memref<6x32x96xbf16, #tpu.memory_space<vmem>>, vector<1x32x96xbf16>
      %61 = vector.shape_cast %60 : vector<1x32x96xbf16> to vector<32x96xbf16>
      %cst_37 = arith.constant dense<0.000000e+00> : vector<16x96xf32>
      %62 = tpu.matmul %58, %61, %cst_37 {dimension_numbers = #tpu.dot_dimension_numbers<[1], [0], [0], [1], [0, 0, 1, 1], [], []>} : vector<16x32xbf16>, vector<32x96xbf16>, vector<16x96xf32> -> vector<16x96xf32>
      %63 = vector.broadcast %50 : vector<1x96xf32> to vector<16x96xf32>
      %64 = arith.addf %62, %63 : vector<16x96xf32>
      %65 = vector.shape_cast %64 : vector<16x96xf32> to vector<2x8x96xf32>
      %66 = vector.extract_strided_slice %65 {offsets = [0, 0, 0], sizes = [2, 8, 8], strides = [1, 1, 1]} : vector<2x8x96xf32> to vector<2x8x8xf32>
      %cst_38 = arith.constant 0.353553385 : f32
      %67 = vector.broadcast %cst_38 : f32 to vector<2x8x8xf32>
      %68 = arith.mulf %66, %67 : vector<2x8x8xf32>
      %69 = vector.extract_strided_slice %65 {offsets = [0, 0, 32], sizes = [2, 8, 8], strides = [1, 1, 1]} : vector<2x8x96xf32> to vector<2x8x8xf32>
      %70 = vector.extract_strided_slice %65 {offsets = [0, 0, 64], sizes = [2, 8, 8], strides = [1, 1, 1]} : vector<2x8x96xf32> to vector<2x8x8xf32>
      "tpu.trace_start"() <{level = 10 : i32, message = "bqd,bkd->bqk"}> : () -> ()
      %cst_39 = arith.constant dense<0.000000e+00> : vector<2x8x8xf32>
      %71 = tpu.matmul %68, %69, %cst_39 {dimension_numbers = #tpu.dot_dimension_numbers<[2], [2], [1], [1], [0, 0, 0, 1, 1, 1], [0], [0]>} : vector<2x8x8xf32>, vector<2x8x8xf32>, vector<2x8x8xf32> -> vector<2x8x8xf32>
      "tpu.trace_stop"() : () -> ()
      %72 = vector.broadcast %26 : vector<2x1x8xf32> to vector<2x8x8xf32>
      %73 = arith.addf %71, %72 : vector<2x8x8xf32>
      %cst_40 = arith.constant dense<0xFF800000> : vector<2x8xf32>
      %74 = vector.multi_reduction <maximumf>, %73, %cst_40 [2] : vector<2x8x8xf32> to vector<2x8xf32>
      %75 = vector.shape_cast %74 : vector<2x8xf32> to vector<2x8x1xf32>
      %76 = vector.broadcast %75 : vector<2x8x1xf32> to vector<2x8x8xf32>
      %77 = arith.subf %73, %76 : vector<2x8x8xf32>
      %78 = math.exp %77 : vector<2x8x8xf32>
      %cst_41 = arith.constant dense<0.000000e+00> : vector<2x8xf32>
      %79 = vector.multi_reduction <add>, %78, %cst_41 [2] : vector<2x8x8xf32> to vector<2x8xf32>
      %80 = vector.shape_cast %79 : vector<2x8xf32> to vector<2x8x1xf32>
      %81 = vector.broadcast %80 : vector<2x8x1xf32> to vector<2x8x8xf32>
      %82 = arith.divf %78, %81 : vector<2x8x8xf32>
      "tpu.trace_start"() <{level = 10 : i32, message = "bqk,bkd->bqd"}> : () -> ()
      %cst_42 = arith.constant dense<0.000000e+00> : vector<2x8x8xf32>
      %83 = tpu.matmul %82, %70, %cst_42 {dimension_numbers = #tpu.dot_dimension_numbers<[2], [1], [1], [2], [0, 0, 0, 1, 1, 2], [0], [0]>} : vector<2x8x8xf32>, vector<2x8x8xf32>, vector<2x8x8xf32> -> vector<2x8x8xf32>
      "tpu.trace_stop"() : () -> ()
      %84 = vector.extract_strided_slice %65 {offsets = [0, 0, 8], sizes = [2, 8, 8], strides = [1, 1, 1]} : vector<2x8x96xf32> to vector<2x8x8xf32>
      %cst_43 = arith.constant 0.353553385 : f32
      %85 = vector.broadcast %cst_43 : f32 to vector<2x8x8xf32>
      %86 = arith.mulf %84, %85 : vector<2x8x8xf32>
      %87 = vector.extract_strided_slice %65 {offsets = [0, 0, 40], sizes = [2, 8, 8], strides = [1, 1, 1]} : vector<2x8x96xf32> to vector<2x8x8xf32>
      %88 = vector.extract_strided_slice %65 {offsets = [0, 0, 72], sizes = [2, 8, 8], strides = [1, 1, 1]} : vector<2x8x96xf32> to vector<2x8x8xf32>
      "tpu.trace_start"() <{level = 10 : i32, message = "bqd,bkd->bqk"}> : () -> ()
      %cst_44 = arith.constant dense<0.000000e+00> : vector<2x8x8xf32>
      %89 = tpu.matmul %86, %87, %cst_44 {dimension_numbers = #tpu.dot_dimension_numbers<[2], [2], [1], [1], [0, 0, 0, 1, 1, 1], [0], [0]>} : vector<2x8x8xf32>, vector<2x8x8xf32>, vector<2x8x8xf32> -> vector<2x8x8xf32>
      "tpu.trace_stop"() : () -> ()
      %90 = vector.broadcast %26 : vector<2x1x8xf32> to vector<2x8x8xf32>
      %91 = arith.addf %89, %90 : vector<2x8x8xf32>
      %cst_45 = arith.constant dense<0xFF800000> : vector<2x8xf32>
      %92 = vector.multi_reduction <maximumf>, %91, %cst_45 [2] : vector<2x8x8xf32> to vector<2x8xf32>
      %93 = vector.shape_cast %92 : vector<2x8xf32> to vector<2x8x1xf32>
      %94 = vector.broadcast %93 : vector<2x8x1xf32> to vector<2x8x8xf32>
      %95 = arith.subf %91, %94 : vector<2x8x8xf32>
      %96 = math.exp %95 : vector<2x8x8xf32>
      %cst_46 = arith.constant dense<0.000000e+00> : vector<2x8xf32>
      %97 = vector.multi_reduction <add>, %96, %cst_46 [2] : vector<2x8x8xf32> to vector<2x8xf32>
      %98 = vector.shape_cast %97 : vector<2x8xf32> to vector<2x8x1xf32>
      %99 = vector.broadcast %98 : vector<2x8x1xf32> to vector<2x8x8xf32>
      %100 = arith.divf %96, %99 : vector<2x8x8xf32>
      "tpu.trace_start"() <{level = 10 : i32, message = "bqk,bkd->bqd"}> : () -> ()
      %cst_47 = arith.constant dense<0.000000e+00> : vector<2x8x8xf32>
      %101 = tpu.matmul %100, %88, %cst_47 {dimension_numbers = #tpu.dot_dimension_numbers<[2], [1], [1], [2], [0, 0, 0, 1, 1, 2], [0], [0]>} : vector<2x8x8xf32>, vector<2x8x8xf32>, vector<2x8x8xf32> -> vector<2x8x8xf32>
      "tpu.trace_stop"() : () -> ()
      %102 = vector.extract_strided_slice %65 {offsets = [0, 0, 16], sizes = [2, 8, 8], strides = [1, 1, 1]} : vector<2x8x96xf32> to vector<2x8x8xf32>
      %cst_48 = arith.constant 0.353553385 : f32
      %103 = vector.broadcast %cst_48 : f32 to vector<2x8x8xf32>
      %104 = arith.mulf %102, %103 : vector<2x8x8xf32>
      %105 = vector.extract_strided_slice %65 {offsets = [0, 0, 48], sizes = [2, 8, 8], strides = [1, 1, 1]} : vector<2x8x96xf32> to vector<2x8x8xf32>
      %106 = vector.extract_strided_slice %65 {offsets = [0, 0, 80], sizes = [2, 8, 8], strides = [1, 1, 1]} : vector<2x8x96xf32> to vector<2x8x8xf32>
      "tpu.trace_start"() <{level = 10 : i32, message = "bqd,bkd->bqk"}> : () -> ()
      %cst_49 = arith.constant dense<0.000000e+00> : vector<2x8x8xf32>
      %107 = tpu.matmul %104, %105, %cst_49 {dimension_numbers = #tpu.dot_dimension_numbers<[2], [2], [1], [1], [0, 0, 0, 1, 1, 1], [0], [0]>} : vector<2x8x8xf32>, vector<2x8x8xf32>, vector<2x8x8xf32> -> vector<2x8x8xf32>
      "tpu.trace_stop"() : () -> ()
      %108 = vector.broadcast %26 : vector<2x1x8xf32> to vector<2x8x8xf32>
      %109 = arith.addf %107, %108 : vector<2x8x8xf32>
      %cst_50 = arith.constant dense<0xFF800000> : vector<2x8xf32>
      %110 = vector.multi_reduction <maximumf>, %109, %cst_50 [2] : vector<2x8x8xf32> to vector<2x8xf32>
      %111 = vector.shape_cast %110 : vector<2x8xf32> to vector<2x8x1xf32>
      %112 = vector.broadcast %111 : vector<2x8x1xf32> to vector<2x8x8xf32>
      %113 = arith.subf %109, %112 : vector<2x8x8xf32>
      %114 = math.exp %113 : vector<2x8x8xf32>
      %cst_51 = arith.constant dense<0.000000e+00> : vector<2x8xf32>
      %115 = vector.multi_reduction <add>, %114, %cst_51 [2] : vector<2x8x8xf32> to vector<2x8xf32>
      %116 = vector.shape_cast %115 : vector<2x8xf32> to vector<2x8x1xf32>
      %117 = vector.broadcast %116 : vector<2x8x1xf32> to vector<2x8x8xf32>
      %118 = arith.divf %114, %117 : vector<2x8x8xf32>
      "tpu.trace_start"() <{level = 10 : i32, message = "bqk,bkd->bqd"}> : () -> ()
      %cst_52 = arith.constant dense<0.000000e+00> : vector<2x8x8xf32>
      %119 = tpu.matmul %118, %106, %cst_52 {dimension_numbers = #tpu.dot_dimension_numbers<[2], [1], [1], [2], [0, 0, 0, 1, 1, 2], [0], [0]>} : vector<2x8x8xf32>, vector<2x8x8xf32>, vector<2x8x8xf32> -> vector<2x8x8xf32>
      "tpu.trace_stop"() : () -> ()
      %120 = vector.extract_strided_slice %65 {offsets = [0, 0, 24], sizes = [2, 8, 8], strides = [1, 1, 1]} : vector<2x8x96xf32> to vector<2x8x8xf32>
      %cst_53 = arith.constant 0.353553385 : f32
      %121 = vector.broadcast %cst_53 : f32 to vector<2x8x8xf32>
      %122 = arith.mulf %120, %121 : vector<2x8x8xf32>
      %123 = vector.extract_strided_slice %65 {offsets = [0, 0, 56], sizes = [2, 8, 8], strides = [1, 1, 1]} : vector<2x8x96xf32> to vector<2x8x8xf32>
      %124 = vector.extract_strided_slice %65 {offsets = [0, 0, 88], sizes = [2, 8, 8], strides = [1, 1, 1]} : vector<2x8x96xf32> to vector<2x8x8xf32>
      "tpu.trace_start"() <{level = 10 : i32, message = "bqd,bkd->bqk"}> : () -> ()
      %cst_54 = arith.constant dense<0.000000e+00> : vector<2x8x8xf32>
      %125 = tpu.matmul %122, %123, %cst_54 {dimension_numbers = #tpu.dot_dimension_numbers<[2], [2], [1], [1], [0, 0, 0, 1, 1, 1], [0], [0]>} : vector<2x8x8xf32>, vector<2x8x8xf32>, vector<2x8x8xf32> -> vector<2x8x8xf32>
      "tpu.trace_stop"() : () -> ()
      %126 = vector.broadcast %26 : vector<2x1x8xf32> to vector<2x8x8xf32>
      %127 = arith.addf %125, %126 : vector<2x8x8xf32>
      %cst_55 = arith.constant dense<0xFF800000> : vector<2x8xf32>
      %128 = vector.multi_reduction <maximumf>, %127, %cst_55 [2] : vector<2x8x8xf32> to vector<2x8xf32>
      %129 = vector.shape_cast %128 : vector<2x8xf32> to vector<2x8x1xf32>
      %130 = vector.broadcast %129 : vector<2x8x1xf32> to vector<2x8x8xf32>
      %131 = arith.subf %127, %130 : vector<2x8x8xf32>
      %132 = math.exp %131 : vector<2x8x8xf32>
      %cst_56 = arith.constant dense<0.000000e+00> : vector<2x8xf32>
      %133 = vector.multi_reduction <add>, %132, %cst_56 [2] : vector<2x8x8xf32> to vector<2x8xf32>
      %134 = vector.shape_cast %133 : vector<2x8xf32> to vector<2x8x1xf32>
      %135 = vector.broadcast %134 : vector<2x8x1xf32> to vector<2x8x8xf32>
      %136 = arith.divf %132, %135 : vector<2x8x8xf32>
      "tpu.trace_start"() <{level = 10 : i32, message = "bqk,bkd->bqd"}> : () -> ()
      %cst_57 = arith.constant dense<0.000000e+00> : vector<2x8x8xf32>
      %137 = tpu.matmul %136, %124, %cst_57 {dimension_numbers = #tpu.dot_dimension_numbers<[2], [1], [1], [2], [0, 0, 0, 1, 1, 2], [0], [0]>} : vector<2x8x8xf32>, vector<2x8x8xf32>, vector<2x8x8xf32> -> vector<2x8x8xf32>
      "tpu.trace_stop"() : () -> ()
      %138 = tpu.concatenate %83, %101, %119, %137 in 2 : vector<2x8x8xf32>, vector<2x8x8xf32>, vector<2x8x8xf32>, vector<2x8x8xf32> -> vector<2x8x32xf32>
      %139 = vector.shape_cast %138 : vector<2x8x32xf32> to vector<16x32xf32>
      %140 = arith.truncf %139 : vector<16x32xf32> to vector<16x32xbf16>
      %141 = arith.index_cast %45 : i32 to index
      %c0_58 = arith.constant 0 : index
      %c0_59 = arith.constant 0 : index
      %142 = vector.load %arg4[%141, %c0_58, %c0_59] : memref<6x32x32xbf16, #tpu.memory_space<vmem>>, vector<1x32x32xbf16>
      %143 = vector.shape_cast %142 : vector<1x32x32xbf16> to vector<32x32xbf16>
      %cst_60 = arith.constant dense<0.000000e+00> : vector<16x32xf32>
      %144 = tpu.matmul %140, %143, %cst_60 {dimension_numbers = #tpu.dot_dimension_numbers<[1], [0], [0], [1], [0, 0, 1, 1], [], []>} : vector<16x32xbf16>, vector<32x32xbf16>, vector<16x32xf32> -> vector<16x32xf32>
      %145 = vector.broadcast %51 : vector<1x32xf32> to vector<16x32xf32>
      %146 = arith.addf %144, %145 : vector<16x32xf32>
      %147 = arith.addf %146, %46 : vector<16x32xf32>
      %cst_61 = arith.constant dense<0.000000e+00> : vector<16xf32>
      %148 = vector.multi_reduction <add>, %147, %cst_61 [1] : vector<16x32xf32> to vector<16xf32>
      %149 = vector.shape_cast %148 : vector<16xf32> to vector<16x1xf32>
      %cst_62 = arith.constant 3.200000e+01 : f32
      %150 = vector.broadcast %cst_62 : f32 to vector<16x1xf32>
      %151 = arith.divf %149, %150 : vector<16x1xf32>
      %152 = vector.broadcast %151 : vector<16x1xf32> to vector<16x32xf32>
      %153 = arith.subf %147, %152 : vector<16x32xf32>
      %154 = arith.mulf %153, %153 : vector<16x32xf32>
      %cst_63 = arith.constant dense<0.000000e+00> : vector<16xf32>
      %155 = vector.multi_reduction <add>, %154, %cst_63 [1] : vector<16x32xf32> to vector<16xf32>
      %156 = vector.shape_cast %155 : vector<16xf32> to vector<16x1xf32>
      %cst_64 = arith.constant 3.200000e+01 : f32
      %157 = vector.broadcast %cst_64 : f32 to vector<16x1xf32>
      %158 = arith.divf %156, %157 : vector<16x1xf32>
      %159 = vector.broadcast %151 : vector<16x1xf32> to vector<16x32xf32>
      %160 = arith.subf %147, %159 : vector<16x32xf32>
      %cst_65 = arith.constant 9.99999996E-13 : f32
      %161 = vector.broadcast %cst_65 : f32 to vector<16x1xf32>
      %162 = arith.addf %158, %161 : vector<16x1xf32>
      %163 = math.rsqrt %162 : vector<16x1xf32>
      %164 = vector.broadcast %163 : vector<16x1xf32> to vector<16x32xf32>
      %165 = arith.mulf %160, %164 : vector<16x32xf32>
      %166 = vector.broadcast %52 : vector<1x32xf32> to vector<16x32xf32>
      %167 = arith.mulf %165, %166 : vector<16x32xf32>
      %168 = vector.broadcast %53 : vector<1x32xf32> to vector<16x32xf32>
      %169 = arith.addf %167, %168 : vector<16x32xf32>
      %170 = arith.truncf %169 : vector<16x32xf32> to vector<16x32xbf16>
      %171 = arith.index_cast %45 : i32 to index
      %c0_66 = arith.constant 0 : index
      %c0_67 = arith.constant 0 : index
      %172 = vector.load %arg5[%171, %c0_66, %c0_67] : memref<6x32x64xbf16, #tpu.memory_space<vmem>>, vector<1x32x64xbf16>
      %173 = vector.shape_cast %172 : vector<1x32x64xbf16> to vector<32x64xbf16>
      %cst_68 = arith.constant dense<0.000000e+00> : vector<16x64xf32>
      %174 = tpu.matmul %170, %173, %cst_68 {dimension_numbers = #tpu.dot_dimension_numbers<[1], [0], [0], [1], [0, 0, 1, 1], [], []>} : vector<16x32xbf16>, vector<32x64xbf16>, vector<16x64xf32> -> vector<16x64xf32>
      %175 = vector.broadcast %54 : vector<1x64xf32> to vector<16x64xf32>
      %176 = arith.addf %174, %175 : vector<16x64xf32>
      %177 = arith.mulf %176, %176 : vector<16x64xf32>
      %178 = arith.mulf %176, %177 : vector<16x64xf32>
      %cst_69 = arith.constant 4.471500e-02 : f32
      %179 = vector.broadcast %cst_69 : f32 to vector<16x64xf32>
      %180 = arith.mulf %179, %178 : vector<16x64xf32>
      %181 = arith.addf %176, %180 : vector<16x64xf32>
      %cst_70 = arith.constant 0.797884583 : f32
      %182 = vector.broadcast %cst_70 : f32 to vector<16x64xf32>
      %183 = arith.mulf %182, %181 : vector<16x64xf32>
      %184 = math.tanh %183 : vector<16x64xf32>
      %cst_71 = arith.constant 1.000000e+00 : f32
      %185 = vector.broadcast %cst_71 : f32 to vector<16x64xf32>
      %186 = arith.addf %185, %184 : vector<16x64xf32>
      %cst_72 = arith.constant 5.000000e-01 : f32
      %187 = vector.broadcast %cst_72 : f32 to vector<16x64xf32>
      %188 = arith.mulf %187, %186 : vector<16x64xf32>
      %189 = arith.mulf %176, %188 : vector<16x64xf32>
      %190 = arith.truncf %189 : vector<16x64xf32> to vector<16x64xbf16>
      %191 = arith.index_cast %45 : i32 to index
      %c0_73 = arith.constant 0 : index
      %c0_74 = arith.constant 0 : index
      %192 = vector.load %arg6[%191, %c0_73, %c0_74] : memref<6x64x32xbf16, #tpu.memory_space<vmem>>, vector<1x64x32xbf16>
      %193 = vector.shape_cast %192 : vector<1x64x32xbf16> to vector<64x32xbf16>
      %cst_75 = arith.constant dense<0.000000e+00> : vector<16x32xf32>
      %194 = tpu.matmul %190, %193, %cst_75 {dimension_numbers = #tpu.dot_dimension_numbers<[1], [0], [0], [1], [0, 0, 1, 1], [], []>} : vector<16x64xbf16>, vector<64x32xbf16>, vector<16x32xf32> -> vector<16x32xf32>
      %195 = vector.broadcast %55 : vector<1x32xf32> to vector<16x32xf32>
      %196 = arith.addf %194, %195 : vector<16x32xf32>
      %197 = arith.addf %196, %169 : vector<16x32xf32>
      %cst_76 = arith.constant dense<0.000000e+00> : vector<16xf32>
      %198 = vector.multi_reduction <add>, %197, %cst_76 [1] : vector<16x32xf32> to vector<16xf32>
      %199 = vector.shape_cast %198 : vector<16xf32> to vector<16x1xf32>
      %cst_77 = arith.constant 3.200000e+01 : f32
      %200 = vector.broadcast %cst_77 : f32 to vector<16x1xf32>
      %201 = arith.divf %199, %200 : vector<16x1xf32>
      %202 = vector.broadcast %201 : vector<16x1xf32> to vector<16x32xf32>
      %203 = arith.subf %197, %202 : vector<16x32xf32>
      %204 = arith.mulf %203, %203 : vector<16x32xf32>
      %cst_78 = arith.constant dense<0.000000e+00> : vector<16xf32>
      %205 = vector.multi_reduction <add>, %204, %cst_78 [1] : vector<16x32xf32> to vector<16xf32>
      %206 = vector.shape_cast %205 : vector<16xf32> to vector<16x1xf32>
      %cst_79 = arith.constant 3.200000e+01 : f32
      %207 = vector.broadcast %cst_79 : f32 to vector<16x1xf32>
      %208 = arith.divf %206, %207 : vector<16x1xf32>
      %209 = vector.broadcast %201 : vector<16x1xf32> to vector<16x32xf32>
      %210 = arith.subf %197, %209 : vector<16x32xf32>
      %cst_80 = arith.constant 9.99999996E-13 : f32
      %211 = vector.broadcast %cst_80 : f32 to vector<16x1xf32>
      %212 = arith.addf %208, %211 : vector<16x1xf32>
      %213 = math.rsqrt %212 : vector<16x1xf32>
      %214 = vector.broadcast %213 : vector<16x1xf32> to vector<16x32xf32>
      %215 = arith.mulf %210, %214 : vector<16x32xf32>
      %216 = vector.broadcast %56 : vector<1x32xf32> to vector<16x32xf32>
      %217 = arith.mulf %215, %216 : vector<16x32xf32>
      %218 = vector.broadcast %57 : vector<1x32xf32> to vector<16x32xf32>
      %219 = arith.addf %217, %218 : vector<16x32xf32>
      %c0_81 = arith.constant 0 : index
      %c0_82 = arith.constant 0 : index
      %220 = vector.load %arg11[%c0_81, %c0_82] : memref<16x32xf32, #tpu.memory_space<vmem>>, vector<16x32xf32>
      tpu.vector_store %arg11[%c0_81, %c0_82], %219 {strides = array<i32>} : memref<16x32xf32, #tpu.memory_space<vmem>>, vector<16x32xf32>,
      %c0_83 = arith.constant 0 : index
      %c0_84 = arith.constant 0 : index
      %221 = tpu.strided_load %arg11[%c0_83, %c0_84] {strides = array<i32: 8, 1>} : memref<16x32xf32, #tpu.memory_space<vmem>>, vector<2x32xf32>
      %222 = arith.index_cast %45 : i32 to index
      %c0_85 = arith.constant 0 : index
      %c0_86 = arith.constant 0 : index
      %223 = vector.load %arg12[%222, %c0_85, %c0_86] : memref<6x2x32xf32, #tpu.memory_space<vmem>>, vector<1x2x32xf32>
      %224 = vector.shape_cast %223 : vector<1x2x32xf32> to vector<2x32xf32>
      %225 = vector.shape_cast %221 : vector<2x32xf32> to vector<1x2x32xf32>
      tpu.vector_store %arg12[%222, %c0_85, %c0_86], %225 {strides = array<i32>} : memref<6x2x32xf32, #tpu.memory_space<vmem>>, vector<1x2x32xf32>,
    }
    %c6_i32_13 = arith.constant 6 : i32
    %c5 = arith.constant 5 : index
    %c0_14 = arith.constant 0 : index
    %c0_15 = arith.constant 0 : index
    %28 = vector.load %arg12[%c5, %c0_14, %c0_15] : memref<6x2x32xf32, #tpu.memory_space<vmem>>, vector<1x2x32xf32>
    %29 = vector.shape_cast %28 : vector<1x2x32xf32> to vector<2x32xf32>
    %c4 = arith.constant 4 : index
    %c0_16 = arith.constant 0 : index
    %c0_17 = arith.constant 0 : index
    %30 = vector.load %arg12[%c4, %c0_16, %c0_17] : memref<6x2x32xf32, #tpu.memory_space<vmem>>, vector<1x2x32xf32>
    %31 = vector.shape_cast %30 : vector<1x2x32xf32> to vector<2x32xf32>
    %c3 = arith.constant 3 : index
    %c0_18 = arith.constant 0 : index
    %c0_19 = arith.constant 0 : index
    %32 = vector.load %arg12[%c3, %c0_18, %c0_19] : memref<6x2x32xf32, #tpu.memory_space<vmem>>, vector<1x2x32xf32>
    %33 = vector.shape_cast %32 : vector<1x2x32xf32> to vector<2x32xf32>
    %c2 = arith.constant 2 : index
    %c0_20 = arith.constant 0 : index
    %c0_21 = arith.constant 0 : index
    %34 = vector.load %arg12[%c2, %c0_20, %c0_21] : memref<6x2x32xf32, #tpu.memory_space<vmem>>, vector<1x2x32xf32>
    %35 = vector.shape_cast %34 : vector<1x2x32xf32> to vector<2x32xf32>
    %36 = tpu.concatenate %29, %31, %33, %35 in 1 : vector<2x32xf32>, vector<2x32xf32>, vector<2x32xf32>, vector<2x32xf32> -> vector<2x128xf32>
    %37 = arith.truncf %36 : vector<2x128xf32> to vector<2x128xbf16>
    %c0_22 = arith.constant 0 : index
    %c0_23 = arith.constant 0 : index
    %38 = vector.load %arg8[%c0_22, %c0_23] : memref<128x128xbf16, #tpu.memory_space<vmem>>, vector<128x128xbf16>
    %cst_24 = arith.constant dense<0.000000e+00> : vector<2x128xf32>
    %39 = tpu.matmul %37, %38, %cst_24 {dimension_numbers = #tpu.dot_dimension_numbers<[1], [0], [0], [1], [0, 0, 1, 1], [], []>} : vector<2x128xbf16>, vector<128x128xbf16>, vector<2x128xf32> -> vector<2x128xf32>
    %c0_25 = arith.constant 0 : index
    %c0_26 = arith.constant 0 : index
    %40 = vector.load %arg9[%c0_25, %c0_26] : memref<1x128xf32, #tpu.memory_space<vmem>>, vector<1x128xf32>
    %41 = vector.broadcast %40 : vector<1x128xf32> to vector<2x128xf32>
    %42 = arith.addf %39, %41 : vector<2x128xf32>
    %c0_27 = arith.constant 0 : index
    %c0_28 = arith.constant 0 : index
    %43 = vector.load %arg10[%c0_27, %c0_28] : memref<2x128xf32, #tpu.memory_space<vmem>>, vector<2x128xf32>
    tpu.vector_store %arg10[%c0_27, %c0_28], %42 {strides = array<i32>} : memref<2x128xf32, #tpu.memory_space<vmem>>, vector<2x128xf32>,
    return
  }
}

</mosaic_0001>

<bundles_post_ra>
// kernel: distilbert_concat_forward.1
= control target key start
LH: loop header
LB: loop body
LE: loop exit
PB: predicated region body
PF: predicated region fallthrough
CT: control target
= control target key end

     0   :  { %vm41_vm0 = vcmask 261120   ;;  %s2802_s0 = inlined_call_operand.vmem [shape: f32[16,32], index: 0, kind: input, shape index: {}]   ;;  %s2803_s1 = inlined_call_operand.vmem [shape: f32[2,1,8], index: 1, kind: input, shape index: {}]   ;;  %s2804_s2 = inlined_call_operand.vmem [shape: f32[2,32], index: 2, kind: input, shape index: {}]   ;;  %s2805_s3 = inlined_call_operand.vmem [shape: bf16[6,32,96], index: 3, kind: input, shape index: {}]   ;;  %s2806_s4 = inlined_call_operand.vmem [shape: bf16[6,32,32], index: 4, kind: input, shape index: {}]   ;;  %s2807_s5 = inlined_call_operand.vmem [shape: bf16[6,32,64], index: 5, kind: input, shape index: {}]   ;;  %s2808_s6 = inlined_call_operand.vmem [shape: bf16[6,64,32], index: 6, kind: input, shape index: {}]   ;;  %s2809_s7 = inlined_call_operand.vmem [shape: f32[6,8,128], index: 7, kind: input, shape index: {}]   ;;  %s2810_s8 = inlined_call_operand.vmem [shape: bf16[128,128], index: 8, kind: input, shape index: {}]   ;;  %s2811_s9 = inlined_call_operand.vmem [shape: f32[1,128], index: 9, kind: input, shape index: {}]   ;;  %s2812_s10 = inlined_call_operand.hbm [shape: f32[2,128], index: 10, kind: output, shape index: {}]  }
   0x1   :  { %v37_v0 = vld [vmem:[%s2802_s0] sm:$0xff]  ;;  %v38_v1 = vld [vmem:[%s2802_s0 + $0x8] sm:$0xff] }
   0x2   :  { %15 = vsyncpa [#allocation5], 0  ;;  %v42_v2 = vsel %vm41_vm0, %v37_v0, 0.0  ;;  %v45_v3 = vsel %vm41_vm0, %v38_v1, 0.0  ;;  %v2507_v14 = vld [vmem:[%s2803_s1] ss:$0 sm:$0xff] }
   0x3   :  { %43 = vadd.xlane.f32.xlu0 %v42_v2  ;;  %v2512_v15 = vld [vmem:[%s2803_s1 + $0x1] ss:$0 sm:$0xff]  ;;  %v2023_v23 = vld [vmem:[%s2804_s2] ss:$0 sm:$0xff]  ;;  %s2522_s1 = smov 0  }
   0x4   :  { %v2024_v25 = vld [vmem:[%s2804_s2 + $0x1] ss:$0 sm:$0xff] }
   0x7   :  { %46 = vadd.xlane.f32.xlu0 %v45_v3 }
  0x8c   :  { %v44_v4 = vpop.xlane.xlu0 %43 }
  0x8d   :  { %v49_v5 = vmul.f32 0.03125, %v44_v4 }
  0x8f   :  { %v51_v6 = vsub.f32 %v37_v0, %v49_v5 }
  0x90   :  { %v47_v7 = vpop.xlane.xlu0 %46 }
  0x91   :  { %v50_v8 = vmul.f32 0.03125, %v47_v7  ;;  %v53_v9 = vmul.f32 %v51_v6, %v51_v6 }
  0x93   :  { %v52_v10 = vsub.f32 %v38_v1, %v50_v8  ;;  %v55_v11 = vsel %vm41_vm0, %v53_v9, 0.0 }
  0x94   :  { %56 = vadd.xlane.f32.xlu1 %v55_v11 }
  0x95   :  { %v54_v12 = vmul.f32 %v52_v10, %v52_v10 }
  0x97   :  { %v58_v13 = vsel %vm41_vm0, %v54_v12, 0.0 }
  0x98   :  { %59 = vadd.xlane.f32.xlu1 %v58_v13 }
 0x11d   :  { %v57_v16 = vpop.xlane.xlu1 %56 }
 0x11e   :  { %v61_v17 = vmul.f32 0.03125, %v57_v16 }
 0x120   :  { %v63_v18 = vadd.f32 1e-12, %v61_v17 }
 0x121   :  { %v60_v19 = vpop.xlane.xlu1 %59 }
 0x122   :  { %2306 = vrsqrt.f32 %v63_v18  ;;  %v62_v20 = vmul.f32 0.03125, %v60_v19 }
 0x124   :  { %v64_v21 = vadd.f32 1e-12, %v62_v20 }
 0x126   :  { %2308 = vrsqrt.f32 %v64_v21 }
 0x12f   :  { %v2307_v22 = vpop.eup %2306 }
 0x130   :  { %v67_v24 = vmul.f32 %v2307_v22, %v51_v6 }
 0x132   :  { %v73_v26 = vmul.f32 %v2023_v23, %v67_v24 }
 0x133   :  { %v2309_v27 = vpop.eup %2308 }
 0x134   :  { %v79_v28 = vadd.f32 %v2024_v25, %v73_v26  ;;  %v68_v29 = vmul.f32 %v2309_v27, %v52_v10 }
 0x136   :  { %81 = vst.msk [vmem:[#allocation2] sm:$0xff] %vm41_vm0, %v79_v28  ;;  %v74_v30 = vmul.f32 %v2023_v23, %v68_v29 }
 0x138   :  { %v80_v31 = vadd.f32 %v2024_v25, %v74_v30 }
 0x13a   :  { %82 = vst.msk [vmem:[#allocation2 + $0x8] sm:$0xff] %vm41_vm0, %v80_v31 }
 0x13b LB: > { %v2417_v32 = vmov 0.0   ;;  %vm2418_vm1 = vmmov 0   ;;  %s2081_s2 = sshll.u32 %s2415_s1, 4  ;;  %s2084_s30 = sshll.u32 %s2415_s1, 5  ;;  %v104_v38 = vlaneseq  ;;  %vm181_vm2 = vcmask 64512   ;;  %s2415_s1 = sphi %s2522_s1, %s90_s1  }
 0x13c   : > { %2140 = vmatprep.subr.bf16.mxu0 %v2417_v32  ;;  %2144 = vmatprep.mubr.msk.bf16.mxu0 %vm2418_vm1, %v2417_v32  ;;  %s99_s26 = scalar_lea.vmem %s2805_s3, %s2081_s2  ;;  %s2540_s29 = scalar_lea.vmem %s2806_s4, %s2081_s2  ;;  %vm1525_vm3 = vcmask 130048   ;;  %vm1528_vm4 = vcmask 195584   ;;  %vm1762_vm5 = vcmask 523264   ;;  %vm1852_vm6 = vcmask 254976  }
 0x13d   : > { %2153 = vmatprep.subr.mxu1 %v2417_v32  ;;  %2155 = vmatprep.mubr.msk.f32.mxu1 %vm2418_vm1, %v2417_v32  ;;  %v2325_v33 = vld [vmem:[%s99_s26 + $0x8] sm:$0xff]   ;;  %v2543_v34 = vld [vmem:[#allocation2] sm:$0xff]  ;;  %s2550_s13 = scalar_lea.vmem %s2807_s5, %s2081_s2  ;;  %s2555_s16 = scalar_lea.vmem %s2808_s6, %s2084_s30  ;;  %v2565_v39 = vshrl.u32 %v104_v38, 7 }
 0x13e   : > { %v2326_v36 = vld [vmem:[%s99_s26] sm:$0xff]   ;;  %2141 = vmatpush3.bf16.msra.mxu0 %v2325_v33  ;;  %s2025_s0 = sshll.u32 %s2415_s1, 3  ;;  %s2419_s20 = smov 96  }
 0x13f   : > { %2142 = vmatprep.subr.bf16.mxu0 %v2417_v32  ;;  %s94_s19 = scalar_lea.vmem %s2809_s7, %s2025_s0  ;;  %v106_v40 = vsub.s32 0, %v2565_v39  ;;  %s2420_s21 = smov 64  }
 0x140   : > { %v2571_v41 = vld [vmem:[%s94_s19] sm:$0xff]  ;;  %s2421_s22 = smov 88   ;;  %s2422_s23 = smov 120  }
 0x141   : > { %v2545_v35 = vld [vmem:[#allocation2 + $0x8] sm:$0xff]  ;;  %v107_v42 = vrot.slane %v2571_v41, %v106_v40  ;;  %s2423_s2 = smov 56   ;;  %s2424_s24 = smov 80  }
 0x142   : > { %v96_v37 = vpack.c.bf16 %v2545_v35, %v2543_v34  ;;  %2143 = vmatpush3.bf16.msra.mxu0 %v2326_v36  ;;  %s2425_s25 = smov 112   ;;  %s2426_s26 = smov 48  }
 0x143   : > { %2148 = vmatprep.subr.mxu0 %v2417_v32  ;;  %s2427_s27 = smov 72   ;;  %s2428_s28 = smov 104  }
 0x144   : > { %s2429_s30 = smov 40   ;;  %s2430_s11 = smov 8  }
 0x145   : > { %2145 = vmatmul.mubr.msk.bf16.vlgmr.msra.gmra.mxu0 %vm41_vm0, %v96_v37  ;;  %s2431_s12 = smov 16   ;;  %s2432_s14 = smov 24  }
 0x146   : > { %2150 = vmatprep.mubr.msk.f32.mxu0 %vm2418_vm1, %v2417_v32 }
 0x205   : > { %v157_v43 = vpop.f32.mrf.mxu0 }
 0x206   : > { %v2574_v44 = vadd.f32 %v157_v43, %v107_v42 }
 0x207   : > { %v2146_v45 = vpop.f32.mrf.mxu0 }
 0x208   : > { %179 = vrot.lane.b32.xlu0 %v2574_v44, %s2419_s20  ;;  %v2582_v50 = vmul.f32 0.35355338, %v2574_v44 }
 0x209   : > { %v160_v46 = vpop.f32.mrf.mxu0 }
 0x20a   : > { %v2577_v47 = vadd.f32 %v160_v46, %v107_v42 }
 0x20b   : > { %v2147_v48 = vpop.f32.mrf.mxu0 }
 0x20c   : > { %258 = vrot.lane.b32.xlu0 %v2577_v47, %s2419_s20  ;;  %v2591_v52 = vmul.f32 0.35355338, %v2577_v47 }
 0x27a   : > { %v180_v49 = vpop.permute.xlu0 %179 }
 0x27b   : > { %2149 = vmatpush3.xpose.msk.msra.mxu0 %vm181_vm2, %v180_v49 }
 0x27c   : > { %2163 = vmatprep.subr.mxu0 %v2417_v32 }
 0x27e   : > { %v259_v51 = vpop.permute.xlu0 %258  ;;  %2151 = vmatmul.mubr.msk.f32.vlgmr.msra.gmra.mxu0 %vm181_vm2, %v2582_v50 }
 0x27f   : > { %2154 = vmatpush3.xpose.msk.msra.mxu1 %vm181_vm2, %v259_v51  ;;  %2165 = vmatprep.mubr.msk.f32.mxu0 %vm2418_vm1, %v2417_v32 }
 0x280   : > { %2158 = vmatprep.subr.mxu1 %v2417_v32 }
 0x282   : > { %2156 = vmatmul.mubr.msk.f32.vlgmr.msra.gmra.mxu1 %vm181_vm2, %v2591_v52 }
 0x283   : > { %2160 = vmatprep.mubr.msk.f32.mxu1 %vm2418_vm1, %v2417_v32 }
 0x33e   : > { %v253_v53 = vpop.f32.mrf.mxu0 }
 0x33f   : > { %v254_v54 = vadd.f32 %v2507_v14, %v253_v53 }
 0x340   : > { %v2152_v55 = vpop.f32.mrf.mxu0 }
 0x341   : > { %v335_v56 = vsel %vm181_vm2, %v254_v54, -inf }
 0x342   : > { %v331_v57 = vpop.f32.mrf.mxu1  ;;  %336 = vmax.xlane.f32.xlu1 %v335_v56 }
 0x343   : > { %v332_v58 = vadd.f32 %v2512_v15, %v331_v57 }
 0x344   : > { %v2157_v59 = vpop.f32.mrf.mxu1 }
 0x345   : > { %v338_v60 = vsel %vm181_vm2, %v332_v58, -inf }
 0x346   : > { %339 = vmax.xlane.f32.xlu1 %v338_v60 }
 0x357   : > { %357 = vrot.lane.b32.xlu1 %v2574_v44, %s2420_s21 }
 0x35b   : > { %433 = vrot.lane.b32.xlu1 %v2577_v47, %s2420_s21 }
 0x35f   : > { %511 = vrot.lane.b32.xlu1 %v2574_v44, %s2421_s22 }
 0x363   : > { %589 = vrot.lane.b32.xlu1 %v2577_v47, %s2421_s22 }
 0x3cb   : > { %v337_v61 = vpop.xlane.xlu1 %336 }
 0x3cc   : > { %v341_v62 = vsub.f32 %v254_v54, %v337_v61 }
 0x3ce   : > { %v343_v63 = vmul.f32 1.442695, %v341_v62 }
 0x3cf   : > { %v340_v0 = vpop.xlane.xlu1 %339 }
 0x3d0   : > { %2335 = vpow2.f32 %v343_v63  ;;  %v342_v1 = vsub.f32 %v332_v58, %v340_v0 }
 0x3d2   : > { %v345_v2 = vmul.f32 1.442695, %v342_v1 }
 0x3d3   : > { %v358_v3 = vpop.permute.xlu1 %357 }
 0x3d4   : > { %2337 = vpow2.f32 %v345_v2  ;;  %2159 = vmatpush3.msra.mxu1 %v358_v3 }
 0x3d5   : > { %2168 = vmatprep.subr.mxu1 %v2417_v32 }
 0x3d7   : > { %v434_v4 = vpop.permute.xlu1 %433 }
 0x3d8   : > { %2164 = vmatpush3.msra.mxu0 %v434_v4 }
 0x3d9   : > { %2173 = vmatprep.subr.mxu0 %v2417_v32 }
 0x3db   : > { %v512_v9 = vpop.permute.xlu1 %511 }
 0x3dd   : > { %v2336_v5 = vpop.eup %2335 }
 0x3de   : > { %v347_v6 = vsel %vm181_vm2, %v2336_v5, 0.0 }
 0x3df   : > { %348 = vadd.xlane.f32.xlu0 %v347_v6  ;;  %v590_v10 = vpop.permute.xlu1 %589 }
 0x3e1   : > { %v2338_v7 = vpop.eup %2337 }
 0x3e2   : > { %v350_v8 = vsel %vm181_vm2, %v2338_v7, 0.0 }
 0x3e3   : > { %351 = vadd.xlane.f32.xlu1 %v350_v8 }
 0x3f4   : > { %587 = vrot.lane.b32.xlu1 %v2591_v52, %s2422_s23 }
 0x3f5   : > { %509 = vrot.lane.b32.xlu0 %v2582_v50, %s2422_s23 }
 0x468   : > { %v349_v11 = vpop.xlane.xlu0 %348 }
 0x469   : > { %2339 = vrcp.f32 %v349_v11 }
 0x46c   : > { %v352_v12 = vpop.xlane.xlu1 %351  ;;  %v510_v19 = vpop.permute.xlu0 %509 }
 0x46d   : > { %2341 = vrcp.f32 %v352_v12 }
 0x470   : > { %v588_v20 = vpop.permute.xlu1 %587 }
 0x476   : > { %v2340_v13 = vpop.eup %2339 }
 0x477   : > { %v354_v16 = vmul.f32 %v2340_v13, %v2336_v5 }
 0x479   : > { %2161 = vmatmul.mubr.msk.f32.vlgmr.msra.gmra.mxu1 %vm181_vm2, %v354_v16 }
 0x47a   : > { %v2342_v17 = vpop.eup %2341  ;;  %2169 = vmatpush3.xpose.msk.msra.mxu1 %vm181_vm2, %v512_v9  ;;  %2170 = vmatprep.mubr.msk.f32.mxu1 %vm2418_vm1, %v2417_v32 }
 0x47b   : > { %v356_v18 = vmul.f32 %v2342_v17, %v2338_v7  ;;  %2178 = vmatprep.subr.mxu1 %v2417_v32 }
 0x47d   : > { %2166 = vmatmul.mubr.msk.f32.vlgmr.msra.gmra.mxu0 %vm181_vm2, %v356_v18  ;;  %2171 = vmatmul.mubr.msk.f32.vlgmr.msra.gmra.mxu1 %vm181_vm2, %v510_v19 }
 0x47e   : > { %2174 = vmatpush3.xpose.msk.msra.mxu0 %vm181_vm2, %v590_v10  ;;  %2175 = vmatprep.mubr.msk.f32.mxu0 %vm2418_vm1, %v2417_v32 }
 0x47f   : > { %2183 = vmatprep.subr.mxu0 %v2417_v32  ;;  %2180 = vmatprep.mubr.msk.f32.mxu1 %vm2418_vm1, %v2417_v32 }
 0x481   : > { %2176 = vmatmul.mubr.msk.f32.vlgmr.msra.gmra.mxu0 %vm181_vm2, %v588_v20 }
 0x482   : > { %2185 = vmatprep.mubr.msk.f32.mxu0 %vm2418_vm1, %v2417_v32 }
 0x539   : > { %v2628_v21 = vpop.f32.mrf.mxu1 }
 0x53b   : > { %v2162_v22 = vpop.f32.mrf.mxu1 }
 0x53d   : > { %v2630_v23 = vpop.f32.mrf.mxu0  ;;  %v583_v24 = vpop.f32.mrf.mxu1 }
 0x53e   : > { %v584_v25 = vadd.f32 %v2507_v14, %v583_v24 }
 0x53f   : > { %v2167_v26 = vpop.f32.mrf.mxu0  ;;  %v2172_v27 = vpop.f32.mrf.mxu1 }
 0x540   : > { %v665_v28 = vsel %vm181_vm2, %v584_v25, -inf }
 0x541   : > { %666 = vmax.xlane.f32.xlu1 %v665_v28  ;;  %v661_v29 = vpop.f32.mrf.mxu0 }
 0x542   : > { %v662_v30 = vadd.f32 %v2512_v15, %v661_v29 }
 0x543   : > { %v2177_v31 = vpop.f32.mrf.mxu0 }
 0x544   : > { %v668_v33 = vsel %vm181_vm2, %v662_v30, -inf }
 0x545   : > { %669 = vmax.xlane.f32.xlu0 %v668_v33 }
 0x552   : > { %687 = vrot.lane.b32.xlu1 %v2574_v44, %s2423_s2 }
 0x556   : > { %841 = vrot.lane.b32.xlu1 %v2574_v44, %s2424_s24 }
 0x55a   : > { %919 = vrot.lane.b32.xlu1 %v2577_v47, %s2424_s24 }
 0x55b   : > { %763 = vrot.lane.b32.xlu0 %v2577_v47, %s2423_s2 }
 0x55f   : > { %839 = vrot.lane.b32.xlu0 %v2582_v50, %s2425_s25 }
 0x5ca   : > { %v667_v36 = vpop.xlane.xlu1 %666 }
 0x5cb   : > { %v671_v37 = vsub.f32 %v584_v25, %v667_v36 }
 0x5cd   : > { %v673_v38 = vmul.f32 1.442695, %v671_v37 }
 0x5ce   : > { %v688_v40 = vpop.permute.xlu1 %687  ;;  %v670_v42 = vpop.xlane.xlu0 %669 }
 0x5cf   : > { %2343 = vpow2.f32 %v673_v38  ;;  %v672_v43 = vsub.f32 %v662_v30, %v670_v42  ;;  %2179 = vmatpush3.msra.mxu1 %v688_v40 }
 0x5d0   : > { %2188 = vmatprep.subr.mxu1 %v2417_v32 }
 0x5d1   : > { %v675_v45 = vmul.f32 1.442695, %v672_v43 }
 0x5d2   : > { %v764_v46 = vpop.permute.xlu0 %763  ;;  %v842_v54 = vpop.permute.xlu1 %841 }
 0x5d3   : > { %2345 = vpow2.f32 %v675_v45  ;;  %2184 = vmatpush3.msra.mxu0 %v764_v46 }
 0x5d4   : > { %2193 = vmatprep.subr.mxu0 %v2417_v32 }
 0x5d6   : > { %v920_v55 = vpop.permute.xlu1 %919  ;;  %v840_v62 = vpop.permute.xlu0 %839 }
 0x5dc   : > { %v2344_v48 = vpop.eup %2343 }
 0x5dd   : > { %v677_v49 = vsel %vm181_vm2, %v2344_v48, 0.0 }
 0x5de   : > { %678 = vadd.xlane.f32.xlu1 %v677_v49 }
 0x5e0   : > { %v2346_v51 = vpop.eup %2345 }
 0x5e1   : > { %v680_v53 = vsel %vm181_vm2, %v2346_v51, 0.0 }
 0x5e2   : > { %681 = vadd.xlane.f32.xlu1 %v680_v53 }
 0x5f3   : > { %917 = vrot.lane.b32.xlu1 %v2591_v52, %s2425_s25 }
 0x667   : > { %v679_v56 = vpop.xlane.xlu1 %678 }
 0x668   : > { %2347 = vrcp.f32 %v679_v56 }
 0x66b   : > { %v682_v57 = vpop.xlane.xlu1 %681 }
 0x66c   : > { %2349 = vrcp.f32 %v682_v57 }
 0x66f   : > { %v918_v63 = vpop.permute.xlu1 %917 }
 0x675   : > { %v2348_v58 = vpop.eup %2347 }
 0x676   : > { %v684_v59 = vmul.f32 %v2348_v58, %v2344_v48 }
 0x678   : > { %2181 = vmatmul.mubr.msk.f32.vlgmr.msra.gmra.mxu1 %vm181_vm2, %v684_v59 }
 0x679   : > { %v2350_v60 = vpop.eup %2349  ;;  %2189 = vmatpush3.xpose.msk.msra.mxu1 %vm181_vm2, %v842_v54  ;;  %2190 = vmatprep.mubr.msk.f32.mxu1 %vm2418_vm1, %v2417_v32 }
 0x67a   : > { %v686_v61 = vmul.f32 %v2350_v60, %v2346_v51  ;;  %2198 = vmatprep.subr.mxu1 %v2417_v32 }
 0x67c   : > { %2186 = vmatmul.mubr.msk.f32.vlgmr.msra.gmra.mxu0 %vm181_vm2, %v686_v61  ;;  %2191 = vmatmul.mubr.msk.f32.vlgmr.msra.gmra.mxu1 %vm181_vm2, %v840_v62 }
 0x67d   : > { %2194 = vmatpush3.xpose.msk.msra.mxu0 %vm181_vm2, %v920_v55  ;;  %2195 = vmatprep.mubr.msk.f32.mxu0 %vm2418_vm1, %v2417_v32 }
 0x67e   : > { %2203 = vmatprep.subr.mxu0 %v2417_v32  ;;  %2200 = vmatprep.mubr.msk.f32.mxu1 %vm2418_vm1, %v2417_v32 }
 0x680   : > { %2196 = vmatmul.mubr.msk.f32.vlgmr.msra.gmra.mxu0 %vm181_vm2, %v918_v63 }
 0x681   : > { %2205 = vmatprep.mubr.msk.f32.mxu0 %vm2418_vm1, %v2417_v32 }
 0x738   : > { %v2662_v0 = vpop.f32.mrf.mxu1 }
 0x73a   : > { %v2182_v1 = vpop.f32.mrf.mxu1 }
 0x73c   : > { %v2664_v2 = vpop.f32.mrf.mxu0  ;;  %v913_v3 = vpop.f32.mrf.mxu1 }
 0x73d   : > { %v2310_v4 = vpack.i.bf16 %v2664_v2, %v2662_v0  ;;  %v914_v5 = vadd.f32 %v2507_v14, %v913_v3 }
 0x73e   : > { %v2187_v6 = vpop.f32.mrf.mxu0  ;;  %v2192_v7 = vpop.f32.mrf.mxu1 }
 0x73f   : > { %v995_v8 = vsel %vm181_vm2, %v914_v5, -inf }
 0x740   : > { %996 = vmax.xlane.f32.xlu0 %v995_v8  ;;  %v991_v9 = vpop.f32.mrf.mxu0 }
 0x741   : > { %v992_v10 = vadd.f32 %v2512_v15, %v991_v9 }
 0x742   : > { %v2197_v11 = vpop.f32.mrf.mxu0 }
 0x743   : > { %v998_v12 = vsel %vm181_vm2, %v992_v10, -inf }
 0x744   : > { %999 = vmax.xlane.f32.xlu1 %v998_v12  ;;  %v2328_v12 = vld [vmem:[%s2540_s29] sm:$0xff]  }
 0x755   : > { %1017 = vrot.lane.b32.xlu1 %v2574_v44, %s2426_s26 }
 0x759   : > { %1171 = vrot.lane.b32.xlu1 %v2574_v44, %s2427_s27 }
 0x75d   : > { %1249 = vrot.lane.b32.xlu1 %v2577_v47, %s2427_s27 }
 0x761   : > { %1247 = vrot.lane.b32.xlu1 %v2591_v52, %s2428_s28 }
 0x7c9   : > { %v997_v13 = vpop.xlane.xlu0 %996 }
 0x7ca   : > { %v1001_v16 = vsub.f32 %v914_v5, %v997_v13 }
 0x7cc   : > { %v1003_v17 = vmul.f32 1.442695, %v1001_v16 }
 0x7cd   : > { %v1000_v18 = vpop.xlane.xlu1 %999 }
 0x7ce   : > { %2351 = vpow2.f32 %v1003_v17  ;;  %v1002_v19 = vsub.f32 %v992_v10, %v1000_v18 }
 0x7d0   : > { %v1005_v20 = vmul.f32 1.442695, %v1002_v19 }
 0x7d1   : > { %v1018_v22 = vpop.permute.xlu1 %1017 }
 0x7d2   : > { %2353 = vpow2.f32 %v1005_v20  ;;  %2199 = vmatpush3.msra.mxu1 %v1018_v22 }
 0x7d3   : > { %2208 = vmatprep.subr.mxu1 %v2417_v32 }
 0x7d5   : > { %v1172_v30 = vpop.permute.xlu1 %1171 }
 0x7d9   : > { %v1250_v37 = vpop.permute.xlu1 %1249 }
 0x7db   : > { %v2352_v24 = vpop.eup %2351 }
 0x7dc   : > { %v1007_v25 = vsel %vm181_vm2, %v2352_v24, 0.0 }
 0x7dd   : > { %1008 = vadd.xlane.f32.xlu0 %v1007_v25  ;;  %v1248_v40 = vpop.permute.xlu1 %1247 }
 0x7df   : > { %v2354_v26 = vpop.eup %2353 }
 0x7e0   : > { %v1010_v27 = vsel %vm181_vm2, %v2354_v26, 0.0 }
 0x7e1   : > { %1011 = vadd.xlane.f32.xlu0 %v1010_v27 }
 0x7f7   : > { %1093 = vrot.lane.b32.xlu0 %v2577_v47, %s2426_s26 }
 0x7fb   : > { %1169 = vrot.lane.b32.xlu0 %v2582_v50, %s2428_s28 }
 0x866   : > { %v1009_v52 = vpop.xlane.xlu0 %1008 }
 0x867   : > { %2355 = vrcp.f32 %v1009_v52 }
 0x86a   : > { %v1012_v28 = vpop.xlane.xlu0 %1011 }
 0x86b   : > { %2357 = vrcp.f32 %v1012_v28 }
 0x86e   : > { %v1094_v29 = vpop.permute.xlu0 %1093 }
 0x86f   : > { %2204 = vmatpush3.msra.mxu0 %v1094_v29 }
 0x870   : > { %2213 = vmatprep.subr.mxu0 %v2417_v32 }
 0x872   : > { %v1170_v38 = vpop.permute.xlu0 %1169 }
 0x874   : > { %v2356_v31 = vpop.eup %2355 }
 0x875   : > { %v1014_v33 = vmul.f32 %v2356_v31, %v2352_v24 }
 0x877   : > { %2201 = vmatmul.mubr.msk.f32.vlgmr.msra.gmra.mxu1 %vm181_vm2, %v1014_v33 }
 0x878   : > { %v2358_v36 = vpop.eup %2357  ;;  %2209 = vmatpush3.xpose.msk.msra.mxu1 %vm181_vm2, %v1172_v30  ;;  %2210 = vmatprep.mubr.msk.f32.mxu1 %vm2418_vm1, %v2417_v32 }
 0x879   : > { %v1016_v50 = vmul.f32 %v2358_v36, %v2354_v26  ;;  %2218 = vmatprep.subr.mxu1 %v2417_v32 }
 0x87b   : > { %2206 = vmatmul.mubr.msk.f32.vlgmr.msra.gmra.mxu0 %vm181_vm2, %v1016_v50  ;;  %2211 = vmatmul.mubr.msk.f32.vlgmr.msra.gmra.mxu1 %vm181_vm2, %v1170_v38 }
 0x87c   : > { %2214 = vmatpush3.xpose.msk.msra.mxu0 %vm181_vm2, %v1250_v37  ;;  %2215 = vmatprep.mubr.msk.f32.mxu0 %vm2418_vm1, %v2417_v32 }
 0x87d   : > { %2223 = vmatprep.subr.mxu0 %v2417_v32  ;;  %2220 = vmatprep.mubr.msk.f32.mxu1 %vm2418_vm1, %v2417_v32 }
 0x87f   : > { %2216 = vmatmul.mubr.msk.f32.vlgmr.msra.gmra.mxu0 %vm181_vm2, %v1248_v40  ;;  %v1540_v40 = vsub.s32 1, %v2565_v39 }
 0x880   : > { %2225 = vmatprep.mubr.msk.f32.mxu0 %vm2418_vm1, %v2417_v32 }
 0x937   : > { %v1089_v42 = vpop.f32.mrf.mxu1 }
 0x939   : > { %v2202_v43 = vpop.f32.mrf.mxu1 }
 0x93b   : > { %v1165_v45 = vpop.f32.mrf.mxu0  ;;  %v1243_v46 = vpop.f32.mrf.mxu1 }
 0x93c   : > { %v1244_v48 = vadd.f32 %v2507_v14, %v1243_v46  ;;  %v2315_v58 = vpack.i.bf16 %v1165_v45, %v1089_v42  ;;  %v1541_v42 = vrot.slane %v2571_v41, %v1540_v40 }
 0x93d   : > { %v2207_v49 = vpop.f32.mrf.mxu0  ;;  %v2212_v51 = vpop.f32.mrf.mxu1 }
 0x93e   : > { %v1325_v53 = vsel %vm181_vm2, %v1244_v48, -inf }
 0x93f   : > { %1326 = vmax.xlane.f32.xlu0 %v1325_v53  ;;  %v1321_v54 = vpop.f32.mrf.mxu0 }
 0x940   : > { %v1322_v55 = vadd.f32 %v2512_v15, %v1321_v54 }
 0x941   : > { %v2217_v56 = vpop.f32.mrf.mxu0 }
 0x942   : > { %v1328_v57 = vsel %vm181_vm2, %v1322_v55, -inf }
 0x943   : > { %1329 = vmax.xlane.f32.xlu1 %v1328_v57 }
 0x954   : > { %1347 = vrot.lane.b32.xlu1 %v2574_v44, %s2429_s30 }
 0x958   : > { %2311 = vrot.lane.b32.xlu1 %v2310_v4, %s2430_s11 }
 0x95c   : > { %2316 = vrot.lane.b32.xlu1 %v2315_v58, %s2431_s12 }
 0x9c8   : > { %v1327_v59 = vpop.xlane.xlu0 %1326 }
 0x9c9   : > { %v1331_v60 = vsub.f32 %v1244_v48, %v1327_v59 }
 0x9cb   : > { %v1333_v61 = vmul.f32 1.442695, %v1331_v60 }
 0x9cc   : > { %v1330_v62 = vpop.xlane.xlu1 %1329 }
 0x9cd   : > { %2359 = vpow2.f32 %v1333_v61  ;;  %v1332_v63 = vsub.f32 %v1322_v55, %v1330_v62 }
 0x9cf   : > { %v1335_v1 = vmul.f32 1.442695, %v1332_v63 }
 0x9d0   : > { %v1348_v3 = vpop.permute.xlu1 %1347 }
 0x9d1   : > { %2361 = vpow2.f32 %v1335_v1  ;;  %2219 = vmatpush3.msra.mxu1 %v1348_v3  ;;  %v2329_v1 = vld [vmem:[%s2550_s13 + $0x8] sm:$0xff]  }
 0x9d2   : > { %2228 = vmatprep.subr.bf16.mxu1 %v2417_v32 }
 0x9d4   : > { %v2312_v20 = vpop.permute.xlu1 %2311 }
 0x9d5   : > { %v2314_v24 = vunpack.i.h.bf16 %v2312_v20  ;;  %v2313_v25 = vunpack.i.l.bf16 %v2312_v20  ;;  %v2331_v20 = vld [vmem:[%s2555_s16 + $0x18] sm:$0xff]  }
 0x9d7   : > { %v1524_v28 = vsel %vm181_vm2, %v2630_v23, %v2314_v24  ;;  %v1523_v29 = vsel %vm181_vm2, %v2628_v21, %v2313_v25  ;;  %v2333_v24 = vld [vmem:[%s2555_s16 + $0x8] sm:$0xff]   ;;  %v2334_v25 = vld [vmem:[%s2555_s16] sm:$0xff]  }
 0x9d8   : > { %v2317_v22 = vpop.permute.xlu1 %2316 }
 0x9d9   : > { %v2319_v26 = vunpack.i.h.bf16 %v2317_v22  ;;  %v2318_v27 = vunpack.i.l.bf16 %v2317_v22  ;;  %v2332_v22 = vld [vmem:[%s2555_s16 + $0x10] sm:$0xff]  }
 0x9da   : > { %v2360_v44 = vpop.eup %2359 }
 0x9db   : > { %v1337_v5 = vsel %vm181_vm2, %v2360_v44, 0.0  ;;  %v1526_v33 = vsel %vm1525_vm3, %v1523_v29, %v2318_v27  ;;  %v1527_v36 = vsel %vm1525_vm3, %v1524_v28, %v2319_v26  ;;  %v1647_v26 = vsub.s32 4, %v2565_v39 }
 0x9dc   : > { %1338 = vadd.xlane.f32.xlu0 %v1337_v5 }
 0x9dd   : > { %v1648_v27 = vrot.slane %v2571_v41, %v1647_v26 }
 0x9de   : > { %v2362_v0 = vpop.eup %2361 }
 0x9df   : > { %v1340_v2 = vsel %vm181_vm2, %v2362_v0, 0.0 }
 0x9e0   : > { %1341 = vadd.xlane.f32.xlu0 %v1340_v2 }
 0x9f6   : > { %1423 = vrot.lane.b32.xlu0 %v2577_v47, %s2429_s30  ;;  %v2327_v47 = vld [vmem:[%s2540_s29 + $0x8] sm:$0xff]   ;;  %s2071_s29 = sshll.u32 %s2415_s1, 1  ;;  %s90_s1 = sadd.s32 1, %s2415_s1  }
 0x9f7   : > { %p87_p0 = scmp.ge.s32.totalorder %s90_s1, 6  }
 0x9f8   :  { %s2433_s15 = smov (%p87_p0), 32   ;;  %s2434_s16 = smov (%p87_p0), 96   ;;  %vm2436_vm7 = vmmov (%p87_p0), 0   ;;  %v2381_v14 = vld [vmem:[%s2810_s8 + $0x28] sm:$0xff] (%p87_p0)   ;;  %v2382_v15 = vld [vmem:[%s2810_s8 + $0x20] sm:$0xff] (%p87_p0)   ;;  %vm1877_vm8 = vcmask (%p87_p0), 785408  }
 0x9f9   :  { %s2437_s3 = smov (%p87_p0), 64   ;;  %s2438_s28 = smov (%p87_p0), [#allocation4]  }
 0xa65   : > { %v1339_v4 = vpop.xlane.xlu0 %1338 }
 0xa66   : > { %2363 = vrcp.f32 %v1339_v4 }
 0xa69   : > { %v1342_v6 = vpop.xlane.xlu0 %1341 }
 0xa6a   : > { %2365 = vrcp.f32 %v1342_v6  ;;  %v1628_v6 = vsub.s32 2, %v2565_v39 }
 0xa6d   : > { %v1424_v7 = vpop.permute.xlu0 %1423 }
 0xa6e   : > { %2224 = vmatpush3.msra.mxu0 %v1424_v7 }
 0xa6f   : > { %2236 = vmatprep.subr.bf16.mxu0 %v2417_v32 }
 0xa73   : > { %v2364_v8 = vpop.eup %2363 }
 0xa74   : > { %v1344_v9 = vmul.f32 %v2364_v8, %v2360_v44 }
 0xa76   : > { %2221 = vmatmul.mubr.msk.f32.vlgmr.msra.gmra.mxu1 %vm181_vm2, %v1344_v9  ;;  %v1629_v9 = vrot.slane %v2571_v41, %v1628_v6 }
 0xa77   : > { %v2366_v10 = vpop.eup %2365  ;;  %2232 = vmatprep.mubr.msk.bf16.mxu1 %vm2418_vm1, %v2417_v32  ;;  %2229 = vmatpush3.bf16.msra.mxu1 %v2327_v47 }
 0xa78   : > { %v1346_v11 = vmul.f32 %v2366_v10, %v2362_v0  ;;  %2230 = vmatprep.subr.bf16.mxu1 %v2417_v32  ;;  %v1634_v10 = vsub.s32 3, %v2565_v39 }
 0xa7a   : > { %2226 = vmatmul.mubr.msk.f32.vlgmr.msra.gmra.mxu0 %vm181_vm2, %v1346_v11 }
 0xa7b   : > { %2240 = vmatprep.mubr.msk.bf16.mxu0 %vm2418_vm1, %v2417_v32  ;;  %2231 = vmatpush3.bf16.msra.mxu1 %v2328_v12 }
 0xa7c   : > { %2244 = vmatprep.subr.bf16.mxu1 %v2417_v32  ;;  %2237 = vmatpush3.bf16.msra.mxu0 %v2329_v1 }
 0xa7d   : > { %2238 = vmatprep.subr.bf16.mxu0 %v2417_v32 }
 0xb36   : > { %v1419_v13 = vpop.f32.mrf.mxu1 }
 0xb38   : > { %v2222_v16 = vpop.f32.mrf.mxu1 }
 0xb3a   : > { %v1495_v17 = vpop.f32.mrf.mxu0 }
 0xb3b   : > { %v2320_v18 = vpack.i.bf16 %v1495_v17, %v1419_v13  ;;  %v1635_v13 = vrot.slane %v2571_v41, %v1634_v10 }
 0xb3c   : > { %v2227_v19 = vpop.f32.mrf.mxu0 }
 0xb3d   : > { %2321 = vrot.lane.b32.xlu0 %v2320_v18, %s2432_s14 }
 0xbaf   : > { %v2322_v52 = vpop.permute.xlu0 %2321 }
 0xbb0   : > { %v2324_v30 = vunpack.i.h.bf16 %v2322_v52  ;;  %v2323_v31 = vunpack.i.l.bf16 %v2322_v52 }
 0xbb2   : > { %v1530_v37 = vsel %vm1528_vm4, %v1527_v36, %v2324_v30  ;;  %v1529_v50 = vsel %vm1528_vm4, %v1526_v33, %v2323_v31 }
 0xbb3   : > { %v1531_v38 = vpack.c.bf16 %v1530_v37, %v1529_v50 }
 0xbb5   : > { %2233 = vmatmul.mubr.msk.bf16.vlgmr.msra.gmra.mxu1 %vm41_vm0, %v1531_v38 }
 0xbb6   : > { %2252 = vmatprep.mubr.msk.bf16.mxu1 %vm2418_vm1, %v2417_v32  ;;  %2245 = vmatpush3.bf16.msra.mxu1 %v2331_v20  ;;  %v1843_v20 = vsub.s32 7, %v2565_v39 }
 0xbb7   : > { %2246 = vmatprep.subr.bf16.mxu1 %v2417_v32 }
 0xbba   : > { %2247 = vmatpush3.bf16.msra.mxu1 %v2332_v22 }
 0xbbb   : > { %2248 = vmatprep.subr.bf16.mxu1 %v2417_v32 }
 0xbbe   : > { %2249 = vmatpush3.bf16.msra.mxu1 %v2333_v24 }
 0xbbf   : > { %2250 = vmatprep.subr.bf16.mxu1 %v2417_v32 }
 0xbc2   : > { %2251 = vmatpush3.bf16.msra.mxu1 %v2334_v25  ;;  %v1844_v25 = vrot.slane %v2571_v41, %v1843_v20 }
 0xc75   : > { %v1591_v23 = vpop.f32.mrf.mxu1 }
 0xc76   : > { %v1592_v43 = vadd.f32 %v1591_v23, %v1541_v42 }
 0xc77   : > { %v2234_v45 = vpop.f32.mrf.mxu1 }
 0xc78   : > { %v1598_v21 = vadd.f32 %v1592_v43, %v2543_v34 }
 0xc79   : > { %v1594_v46 = vpop.f32.mrf.mxu1 }
 0xc7a   : > { %v1595_v48 = vadd.f32 %v1594_v46, %v1541_v42  ;;  %v1600_v49 = vsel %vm41_vm0, %v1598_v21, 0.0 }
 0xc7b   : > { %1601 = vadd.xlane.f32.xlu1 %v1600_v49  ;;  %v2235_v51 = vpop.f32.mrf.mxu1 }
 0xc7c   : > { %v1599_v53 = vadd.f32 %v1595_v48, %v2545_v35  ;;  %v2330_v35 = vld [vmem:[%s2550_s13] sm:$0xff]   ;;  %s1851_s13 = scalar_lea.vmem [#allocation3], %s2071_s29 }
 0xc7d   : > { %2239 = vmatpush3.bf16.msra.mxu0 %v2330_v35 }
 0xc7e   : > { %v1603_v54 = vsel %vm41_vm0, %v1599_v53, 0.0 }
 0xc7f   : > { %1604 = vadd.xlane.f32.xlu0 %v1603_v54 }
 0xd04   : > { %v1602_v55 = vpop.xlane.xlu1 %1601 }
 0xd05   : > { %v1606_v56 = vmul.f32 0.03125, %v1602_v55 }
 0xd07   : > { %v1608_v57 = vsub.f32 %v1598_v21, %v1606_v56 }
 0xd08   : > { %v1605_v58 = vpop.xlane.xlu0 %1604 }
 0xd09   : > { %v1607_v59 = vmul.f32 0.03125, %v1605_v58  ;;  %v1610_v60 = vmul.f32 %v1608_v57, %v1608_v57 }
 0xd0b   : > { %v1609_v34 = vsub.f32 %v1599_v53, %v1607_v59  ;;  %v1612_v61 = vsel %vm41_vm0, %v1610_v60, 0.0 }
 0xd0c   : > { %1613 = vadd.xlane.f32.xlu0 %v1612_v61 }
 0xd0d   : > { %v1611_v62 = vmul.f32 %v1609_v34, %v1609_v34 }
 0xd0f   : > { %v1615_v63 = vsel %vm41_vm0, %v1611_v62, 0.0 }
 0xd10   : > { %1616 = vadd.xlane.f32.xlu1 %v1615_v63 }
 0xd95   : > { %v1614_v3 = vpop.xlane.xlu0 %1613 }
 0xd96   : > { %v1618_v44 = vmul.f32 0.03125, %v1614_v3 }
 0xd98   : > { %v1620_v5 = vadd.f32 1e-12, %v1618_v44 }
 0xd99   : > { %v1617_v0 = vpop.xlane.xlu1 %1616 }
 0xd9a   : > { %2367 = vrsqrt.f32 %v1620_v5  ;;  %v1619_v2 = vmul.f32 0.03125, %v1617_v0 }
 0xd9c   : > { %v1621_v4 = vadd.f32 1e-12, %v1619_v2 }
 0xd9e   : > { %2369 = vrsqrt.f32 %v1621_v4 }
 0xda7   : > { %v2368_v7 = vpop.eup %2367 }
 0xda8   : > { %v1624_v8 = vmul.f32 %v2368_v7, %v1608_v57  ;;  %v1736_v57 = vsub.s32 5, %v2565_v39 }
 0xdaa   : > { %v1630_v12 = vmul.f32 %v1629_v9, %v1624_v8  ;;  %v1737_v58 = vrot.slane %v2571_v41, %v1736_v57 }
 0xdab   : > { %v2370_v11 = vpop.eup %2369 }
 0xdac   : > { %v1625_v47 = vmul.f32 %v2370_v11, %v1609_v34  ;;  %v1636_v17 = vadd.f32 %v1635_v13, %v1630_v12 }
 0xdae   : > { %v1631_v16 = vmul.f32 %v1629_v9, %v1625_v47 }
 0xdb0   : > { %v1637_v18 = vadd.f32 %v1635_v13, %v1631_v16 }
 0xdb2   : > { %v1638_v19 = vpack.c.bf16 %v1637_v18, %v1636_v17 }
 0xdb4   : > { %2241 = vmatmul.mubr.msk.bf16.vlgmr.msra.gmra.mxu0 %vm41_vm0, %v1638_v19  ;;  %v1837_v19 = vsub.s32 6, %v2565_v39 }
 0xdb6   : > { %v1838_v22 = vrot.slane %v2571_v41, %v1837_v19 }
 0xe74   : > { %v1698_v52 = vpop.f32.mrf.mxu0 }
 0xe75   : > { %v1699_v28 = vadd.f32 %v1698_v52, %v1648_v27 }
 0xe76   : > { %v2242_v29 = vpop.f32.mrf.mxu0 }
 0xe77   : > { %v1705_v30 = vmul.f32 %v1699_v28, %v1699_v28 }
 0xe78   : > { %v1701_v31 = vpop.f32.mrf.mxu0 }
 0xe79   : > { %v1707_v33 = vmul.f32 %v1705_v30, %v1699_v28  ;;  %v1702_v36 = vadd.f32 %v1701_v31, %v1648_v27 }
 0xe7a   : > { %v2243_v37 = vpop.f32.mrf.mxu0 }
 0xe7b   : > { %v1709_v50 = vmul.f32 0.044715, %v1707_v33  ;;  %v1706_v38 = vmul.f32 %v1702_v36, %v1702_v36  ;;  %v2435_v37 = vmov (%p87_p0), 0.0  }
 0xe7c   :  { %2256 = vmatprep.subr.bf16.mxu0 (%p87_p0), %v2435_v37  ;;  %2272 = vmatprep.mubr.msk.bf16.mxu0 (%p87_p0), %vm2436_vm7, %v2435_v37 }
 0xe7d   : > { %v1711_v40 = vadd.f32 %v1709_v50, %v1699_v28  ;;  %v1708_v42 = vmul.f32 %v1706_v38, %v1702_v36  ;;  %v2379_v50 = vld [vmem:[%s2810_s8 + $0x38] sm:$0xff] (%p87_p0)   ;;  %v2380_v38 = vld [vmem:[%s2810_s8 + $0x30] sm:$0xff] (%p87_p0)  }
 0xe7e   :  { %2257 = vmatpush3.bf16.msra.mxu0 (%p87_p0), %v2379_v50 }
 0xe7f   : > { %v1713_v23 = vmul.f32 0.7978846, %v1711_v40  ;;  %v1710_v32 = vmul.f32 0.044715, %v1708_v42  ;;  %2258 = vmatprep.subr.bf16.mxu0 (%p87_p0), %v2435_v37  ;;  %v2383_v40 = vld [vmem:[%s2810_s8 + $0x18] sm:$0xff] (%p87_p0)   ;;  %v2384_v42 = vld [vmem:[%s2810_s8 + $0x10] sm:$0xff] (%p87_p0)  }
 0xe81   : > { %2371 = vtanh.f32 %v1713_v23  ;;  %v1712_v43 = vadd.f32 %v1710_v32, %v1702_v36  ;;  %v2385_v23 = vld [vmem:[%s2810_s8 + $0x8] sm:$0xff] (%p87_p0)   ;;  %v2386_v32 = vld [vmem:[%s2810_s8] sm:$0xff] (%p87_p0)   ;;  %s1998_s8 = sshll.u32 (%p87_p0), %s2438_s28, 4  ;;  %s1999_s8 = int_to_ptr.vmem [resolvable:$true] %s1998_s8 }
 0xe82   :  { %2259 = vmatpush3.bf16.msra.mxu0 (%p87_p0), %v2380_v38  ;;  %s2387_s30 = scalar_lea.vmem (%p87_p0), %s1999_s8, 32  ;;  %p2392_p2 = scmp.lt.s32.totalorder (%p87_p0), %s1999_s8, %s1999_s8 }
 0xe83   : > { %v1714_v45 = vmul.f32 0.7978846, %v1712_v43  ;;  %2260 = vmatprep.subr.bf16.mxu0 (%p87_p0), %v2435_v37  ;;  %p2388_p1 = scmp.ne.s32.totalorder (%p87_p0), %s1999_s8, %s2387_s30  ;;  %p2393_p3 = scmp.lt.s32.totalorder (%p87_p0), %s2387_s30, %s2387_s30 }
 0xe85   : > { %2373 = vtanh.f32 %v1714_v45  ;;  %p2394_p4 = por (%p87_p0), %p2393_p3, %p2392_p2 }
 0xe86   :  { %2261 = vmatpush3.bf16.msra.mxu0 (%p87_p0), %v2381_v14 }
 0xe87   :  { %2262 = vmatprep.subr.bf16.mxu0 (%p87_p0), %v2435_v37  ;;  %p2395_p5 = pnand (%p87_p0), %p2394_p4, %p2388_p1 }
 0xe8a   :  { %2263 = vmatpush3.bf16.msra.mxu0 (%p87_p0), %v2382_v15 }
 0xe8b   :  { %2264 = vmatprep.subr.bf16.mxu0 (%p87_p0), %v2435_v37 }
 0xe8e   : > { %v2372_v21 = vpop.eup %2371  ;;  %2265 = vmatpush3.bf16.msra.mxu0 (%p87_p0), %v2383_v40 }
 0xe8f   : > { %v1717_v46 = vadd.f32 1.0, %v2372_v21  ;;  %2266 = vmatprep.subr.bf16.mxu0 (%p87_p0), %v2435_v37 }
 0xe91   : > { %v1719_v49 = vmul.f32 0.5, %v1717_v46 }
 0xe92   : > { %v2374_v48 = vpop.eup %2373  ;;  %2267 = vmatpush3.bf16.msra.mxu0 (%p87_p0), %v2384_v42 }
 0xe93   : > { %v1718_v51 = vadd.f32 1.0, %v2374_v48  ;;  %v1721_v54 = vmul.f32 %v1719_v49, %v1699_v28  ;;  %2268 = vmatprep.subr.bf16.mxu0 (%p87_p0), %v2435_v37 }
 0xe95   : > { %v1720_v53 = vmul.f32 0.5, %v1718_v51 }
 0xe96   :  { %2269 = vmatpush3.bf16.msra.mxu0 (%p87_p0), %v2385_v23 }
 0xe97   : > { %v1722_v55 = vmul.f32 %v1720_v53, %v1702_v36  ;;  %2270 = vmatprep.subr.bf16.mxu0 (%p87_p0), %v2435_v37 }
 0xe99   : > { %v1723_v56 = vpack.c.bf16 %v1722_v55, %v1721_v54  ;;  %v2072_v54 = vld [vmem:[%s2811_s9] ss:$0 sm:$0xff] (%p87_p0) }
 0xe9a   :  { %2271 = vmatpush3.bf16.msra.mxu0 (%p87_p0), %v2386_v32 }
 0xe9b   : > { %2253 = vmatmul.mubr.msk.bf16.vlgmr.msra.gmra.mxu1 %vm1762_vm5, %v1723_v56 }
 0xf5b   : > { %v1800_v59 = vpop.f32.mrf.mxu1 }
 0xf5c   : > { %v1801_v60 = vadd.f32 %v1800_v59, %v1737_v58 }
 0xf5d   : > { %v2254_v34 = vpop.f32.mrf.mxu1 }
 0xf5e   : > { %v1807_v61 = vadd.f32 %v1801_v60, %v1636_v17 }
 0xf5f   : > { %v1803_v62 = vpop.f32.mrf.mxu1 }
 0xf60   : > { %v1804_v63 = vadd.f32 %v1803_v62, %v1737_v58  ;;  %v1809_v1 = vsel %vm41_vm0, %v1807_v61, 0.0 }
 0xf61   : > { %1810 = vadd.xlane.f32.xlu0 %v1809_v1  ;;  %v2255_v35 = vpop.f32.mrf.mxu1 }
 0xf62   : > { %v1808_v3 = vadd.f32 %v1804_v63, %v1637_v18 }
 0xf64   : > { %v1812_v44 = vsel %vm41_vm0, %v1808_v3, 0.0 }
 0xf65   : > { %1813 = vadd.xlane.f32.xlu1 %v1812_v44 }
 0xfea   : > { %v1811_v5 = vpop.xlane.xlu0 %1810 }
 0xfeb   : > { %v1815_v0 = vmul.f32 0.03125, %v1811_v5 }
 0xfed   : > { %v1817_v2 = vsub.f32 %v1807_v61, %v1815_v0 }
 0xfee   : > { %v1814_v4 = vpop.xlane.xlu1 %1813 }
 0xfef   : > { %v1816_v6 = vmul.f32 0.03125, %v1814_v4  ;;  %v1819_v7 = vmul.f32 %v1817_v2, %v1817_v2 }
 0xff1   : > { %v1818_v8 = vsub.f32 %v1808_v3, %v1816_v6  ;;  %v1821_v9 = vsel %vm41_vm0, %v1819_v7, 0.0 }
 0xff2   : > { %1822 = vadd.xlane.f32.xlu0 %v1821_v9 }
 0xff3   : > { %v1820_v10 = vmul.f32 %v1818_v8, %v1818_v8 }
 0xff5   : > { %v1824_v11 = vsel %vm41_vm0, %v1820_v10, 0.0 }
 0xff6   : > { %1825 = vadd.xlane.f32.xlu1 %v1824_v11 }
0x107b   : > { %v1823_v47 = vpop.xlane.xlu0 %1822 }
0x107c   : > { %v1827_v12 = vmul.f32 0.03125, %v1823_v47 }
0x107e   : > { %v1829_v13 = vadd.f32 1e-12, %v1827_v12 }
0x107f   : > { %v1826_v16 = vpop.xlane.xlu1 %1825 }
0x1080   : > { %2375 = vrsqrt.f32 %v1829_v13  ;;  %v1828_v17 = vmul.f32 0.03125, %v1826_v16 }
0x1082   : > { %v1830_v18 = vadd.f32 1e-12, %v1828_v17 }
0x1084   : > { %2377 = vrsqrt.f32 %v1830_v18 }
0x108d   : > { %v2376_v24 = vpop.eup %2375 }
0x108e   : > { %v1833_v26 = vmul.f32 %v2376_v24, %v1817_v2 }
0x1090   : > { %v1839_v27 = vmul.f32 %v1838_v22, %v1833_v26 }
0x1091   : > { %v2378_v52 = vpop.eup %2377 }
0x1092   : > { %v1845_v28 = vadd.f32 %v1844_v25, %v1839_v27  ;;  %v1834_v29 = vmul.f32 %v2378_v52, %v1818_v8 }
0x1094   : > { %1847 = vst.msk [vmem:[#allocation2] sm:$0xff] %vm41_vm0, %v1845_v28  ;;  %v1840_v30 = vmul.f32 %v1838_v22, %v1834_v29 }
0x1096   : > { %v1846_v31 = vadd.f32 %v1844_v25, %v1840_v30 }
0x1098   : > { %1848 = vst.msk [vmem:[#allocation2 + $0x8] sm:$0xff] %vm41_vm0, %v1846_v31 }
0x109c   :  { %89 = sbr.rel (!%p87_p0) target bundleno = 315 (0x13b), region = 77 }
0x109f   : > { %v1849_v33 = vld [vmem:[#allocation2] ss:$8 sm:$0x3] }
0x10a0   : > { %1853 = vst.msk [vmem:[%s1851_s13] sm:$0x3] %vm1852_vm6, %v1849_v33 }
0x10a7   :  { %v1857_v39 = vld [vmem:[#allocation3 + $0x8] sm:$0x3]  ;;  %v1859_v41 = vld [vmem:[#allocation3 + $0x6] sm:$0x3]  ;;  %v1861_v36 = vld [vmem:[#allocation3 + $0x4] sm:$0x3] }
0x10a8   :  { %1863 = vrot.lane.b32.xlu0 %v1857_v39, %s2433_s15  ;;  %1871 = vrot.lane.b32.xlu1 %v1861_v36, %s2434_s16  ;;  %v1855_v45 = vld [vmem:[#allocation3 + $0xa] sm:$0x3] }
0x10ac   :  { %1867 = vrot.lane.b32.xlu0 %v1859_v41, %s2437_s3 }
0x111a   :  { %v1864_v43 = vpop.permute.xlu0 %1863  ;;  %v1872_v21 = vpop.permute.xlu1 %1871 }
0x111b   :  { %v1874_v46 = vsel %vm41_vm0, %v1855_v45, %v1864_v43 }
0x111e   :  { %v1868_v48 = vpop.permute.xlu0 %1867 }
0x111f   :  { %v1876_v49 = vsel %vm1762_vm5, %v1874_v46, %v1868_v48 }
0x1120   :  { %v1878_v51 = vsel %vm1877_vm8, %v1876_v49, %v1872_v21 }
0x1121   :  { %v1879_v53 = vpack.c.bf16 %v1878_v51, %v1878_v51 }
0x1123   :  { %2273 = vmatmul.mubr.bf16.vlgmr.msra.gmra.mxu0 %v1879_v53 }
0x11e3   :  { %v1985_v55 = vpop.f32.mrf.mxu0 }
0x11e4   :  { %v1986_v56 = vadd.f32 %v2072_v54, %v1985_v55 }
0x11e5   :  { %v2274_v57 = vpop.f32.mrf.mxu0 }
0x11e6   :  { %1991 = vst [vmem:[#allocation4] sm:$0x3] %v1986_v56 }
0x11e7   :  { %v1988_v58 = vpop.f32.mrf.mxu0 }
0x11e8   :  { %2398 = shalt.err (!%p2395_p5)
}
0x11e9   :  { %2001 = dma.vmem_to_hbm [thread:$0]  %s1999_s8, 32, %s2812_s10, [#allocation5]   ;;  %v2275_v59 = vpop.f32.mrf.mxu0 }
0x11ea   :  { %2411 = dma.done.wait [#allocation5], 32  }
0x11eb   :  { %2412 = vsyncadd [#allocation5], 4294967264 }
0x11ec   :  { %2005 = vsyncpa [#allocation5], 1 }

</bundles_post_ra>
